<compile_context>
chip_gen: v5e
topology: v5e:2x2
jax: 0.10.0
libtpu: 0.0.40
codegen_flags: <defaults>
</compile_context>

<pallas_src>
import functools

import jax
import jax.numpy as jnp
from jax.experimental import pallas as pl
from jax.experimental.pallas import tpu as pltpu


def _round_up(x: int, m: int) -> int:
    return (x + m - 1) // m * m


# ----------------------------------------------------------------------------
# Kernel: fused embedding gather + TransH hyperplane projection + score
# ----------------------------------------------------------------------------
def _transh_kernel(
    # scalar-prefetch (SMEM), each [B_pad] int32
    h_idx_ref, t_idx_ref,
    # tensor inputs
    r_ref,          # VMEM [tb, 1] int32: relation ids for this tile
    relnorm_ref,    # VMEM [R_pad, 2*Dp] f32: resident across grid steps
    ent_hbm,        # HBM  [ent_total, Dp] (memory_space=pl.ANY)
    # output tile (VMEM)
    o_ref,          # [1, 1, tb] lane-dense scores for this batch tile
    # scratch (persist across grid iterations)
    h_buf,          # VMEM [2, tb, Dp]   double-buffered head gather
    t_buf,          # VMEM [2, tb, Dp]   double-buffered tail gather
    sem,            # DMA semaphores, shape (2 streams, 2 slots)
    *, tb: int, Dp: int, l1_flag: bool,
):
    o = pl.program_id(0)
    i = pl.program_id(1)
    n_i = pl.num_programs(1)

    # ---- Fused gather: one row DMA per (example, stream) ---------------------
    def issue_tile(global_tile, slot):
        base = global_tile * tb

        def issue_row(row, carry):
            hi = h_idx_ref[base + row]
            ti = t_idx_ref[base + row]
            pltpu.make_async_copy(
                ent_hbm.at[pl.ds(hi, 1)], h_buf.at[slot, pl.ds(row, 1)],
                sem.at[0, slot]).start()
            pltpu.make_async_copy(
                ent_hbm.at[pl.ds(ti, 1)], t_buf.at[slot, pl.ds(row, 1)],
                sem.at[1, slot]).start()
            return carry

        # Unrolled so SMEM reads + descriptor pushes pack into fewer bundles.
        jax.lax.fori_loop(0, tb, issue_row, 0, unroll=8)

    # Pipeline prologue: first inner step of each outer group gathers its own
    # tile (the inner axis is "arbitrary", so this holds per-core even when
    # the outer axis is sharded across TensorCores).
    @pl.when(i == 0)
    def _():
        issue_tile(o * n_i, 0)

    # Prefetch the next tile's rows into the other slot BEFORE waiting on this
    # one (also keeps the SMEM scalar reads ahead of the .wait()).
    @pl.when(i + 1 < n_i)
    def _():
        issue_tile(o * n_i + i + 1, (i + 1) % 2)

    slot = i % 2
    # Aggregate waits: DMA semaphores count bytes; a full-slot descriptor's
    # size equals the sum of the tb row copies issued into that slot.
    pltpu.make_async_copy(h_buf.at[slot], h_buf.at[slot], sem.at[0, slot]).wait()
    pltpu.make_async_copy(t_buf.at[slot], t_buf.at[slot], sem.at[1, slot]).wait()

    # ---- Compute --------------------------------------------------------------
    h = h_buf[slot].astype(jnp.float32)        # (tb, Dp)
    t = t_buf[slot].astype(jnp.float32)        # (tb, Dp)

    # rel/norm gather from the VMEM-resident table via one-hot matmul on the
    # otherwise-idle MXU (exact: each one-hot row selects one table row).
    rel_rows = relnorm_ref.shape[0]
    rv = r_ref[...]                                              # (tb, 1) int32
    rel_iota = jax.lax.broadcasted_iota(jnp.int32, (tb, rel_rows), 1)
    onehot = (rv == rel_iota).astype(jnp.float32)                # (tb, R_pad)
    rn = jnp.dot(onehot, relnorm_ref[...],
                 preferred_element_type=jnp.float32)             # (tb, 2*Dp)
    r = rn[:, :Dp]      # lane-tile-aligned slice (Dp % 128 == 0)
    w = rn[:, Dp:]

    # Folded hyperplane projections:
    #   proj(h) + r - proj(t) == (h - t) + r - <(h - t), w> * w
    hmt = h - t
    d = hmt + r - jnp.sum(hmt * w, axis=1, keepdims=True) * w

    if l1_flag:
        score = jnp.sum(jnp.abs(d), axis=1)        # (tb,)
    else:
        score = jnp.sum(d * d, axis=1)             # (tb,)

    # Lane-dense store (one small XLU relayout per tile; low priority).
    o_ref[0, 0, :] = score.astype(o_ref.dtype)


# ----------------------------------------------------------------------------
# Wrapper: tiling, padding, pallas_call setup
# ----------------------------------------------------------------------------
def transh_score_pallas(ent_table, relnorm_table, h_idx, t_idx, r_idx, *,
                        l1_flag, max_tile_rows=1024,
                        gather_scratch_bytes=12 * 1024 * 1024):
    """Fused TransH scoring.  Returns float32 scores of shape [B].

    ent_table:     [ent_total, Dp]   Dp = round_up(D, 128), zero-padded columns
    relnorm_table: [R_pad, 2*Dp]     [:, :Dp]=rel emb, [:, Dp:]=hyperplane normal

    On v5e/v6e (128 MiB VMEM) raise max_tile_rows (2048-4096) and
    gather_scratch_bytes (32-48 MiB); the defaults are sized for v7x (64 MiB).
    """
    B = int(h_idx.shape[0])
    ent_total, Dp = int(ent_table.shape[0]), int(ent_table.shape[1])
    R_pad = int(relnorm_table.shape[0])
    assert Dp % 128 == 0 and int(relnorm_table.shape[1]) == 2 * Dp

    # Rows per tile (multiple of 8): double-buffered h+t f32 gather scratch
    # costs 2 streams * 2 slots * Dp * 4 = 16*Dp bytes/row (lane padding is
    # already folded into Dp).
    bytes_per_row = 16 * Dp
    cap = max(8, (gather_scratch_bytes // bytes_per_row) // 8 * 8)
    tb = min(max_tile_rows, cap, _round_up(B, 8))

    num_tiles = -(-B // tb)
    # Even tile count so the "parallel" outer axis can shard across v7x's 2 TCs.
    if num_tiles > 1 and num_tiles % 2 == 1:
        num_tiles += 1
    if num_tiles >= 2:
        n_outer, n_inner = 2, num_tiles // 2
    else:
        n_outer, n_inner = 1, 1
    B_pad = num_tiles * tb

    def _prep_idx(idx):
        idx = jnp.asarray(idx, dtype=jnp.int32)
        if B_pad != B:
            # Padded tail rows gather row 0 (valid, in-bounds); their scores
            # are discarded by the final slice.
            idx = jnp.pad(idx, (0, B_pad - B))
        return idx

    h_idx = _prep_idx(h_idx)
    t_idx = _prep_idx(t_idx)
    r2d = _prep_idx(r_idx).reshape(B_pad, 1)

    kernel = functools.partial(_transh_kernel, tb=tb, Dp=Dp,
                               l1_flag=bool(l1_flag))

    grid_spec = pltpu.PrefetchScalarGridSpec(
        num_scalar_prefetch=2,
        grid=(n_outer, n_inner),
        in_specs=[
            # relation ids, tiled over the batch
            pl.BlockSpec((tb, 1), lambda o, i, hi, ti: (o * n_inner + i, 0)),
            # stacked rel/norm table: constant block index -> VMEM-resident
            pl.BlockSpec((R_pad, 2 * Dp), lambda o, i, hi, ti: (0, 0)),
            # entity table stays in HBM; rows gathered by manual DMA
            pl.BlockSpec(memory_space=pl.ANY),
        ],
        out_specs=pl.BlockSpec((1, 1, tb),
                               lambda o, i, hi, ti: (o * n_inner + i, 0, 0)),
        scratch_shapes=[
            pltpu.VMEM((2, tb, Dp), ent_table.dtype),
            pltpu.VMEM((2, tb, Dp), ent_table.dtype),
            pltpu.SemaphoreType.DMA((2, 2)),       # (stream, slot)
        ],
    )

    # VMEM estimate: double-buffered gather scratch + resident relnorm table
    # (x2 buffers to be safe) + r blocks (lane padded) + output blocks +
    # f32 compute temporaries headroom.
    est_vmem = (2 * 2 * tb * Dp * 4
                + 2 * R_pad * 2 * Dp * 4
                + 2 * tb * 128 * 4
                + 2 * 8 * tb * 4
                + 8 * tb * Dp * 4)
    vmem_limit = int(min(128 * 1024 * 1024,
                         max(32 * 1024 * 1024, 2 * est_vmem)))

    row_bytes = Dp * ent_table.dtype.itemsize
    cost = pl.CostEstimate(
        flops=int(B_pad * (6 * Dp + 2 * R_pad * 2 * Dp)),
        transcendentals=0,
        bytes_accessed=int(2 * B_pad * row_bytes
                           + R_pad * 2 * Dp * 4
                           + 3 * B_pad * 4
                           + B_pad * 4),
    )

    out = pl.pallas_call(
        kernel,
        out_shape=jax.ShapeDtypeStruct((num_tiles, 1, tb), jnp.float32),
        grid_spec=grid_spec,
        compiler_params=pltpu.CompilerParams(
            dimension_semantics=("parallel", "arbitrary"),
            vmem_limit_bytes=vmem_limit,
        ),
        cost_estimate=cost,
    )(h_idx, t_idx, r2d, relnorm_table, ent_table)

    return out.reshape(-1)[:B]


# ----------------------------------------------------------------------------
# TransH model (parameter setup + forward wrapper)
# ----------------------------------------------------------------------------
def xavier_uniform(key, shape, dtype=jnp.float32):
    # torch nn.init.xavier_uniform for a 2-D weight
    bound = float(jnp.sqrt(6.0 / (shape[0] + shape[1])))
    return jax.random.uniform(key, shape, dtype, minval=-bound, maxval=bound)


def l2_normalize_rows(w):
    # F.normalize(w, p=2, dim=1)
    n = jnp.sqrt(jnp.sum(w * w, axis=1, keepdims=True))
    return w / jnp.maximum(n, 1e-12)


class TransHModelPallas:
    def __init__(self, L1_flag, embedding_size, ent_total, rel_total, key):
        self.L1_flag = L1_flag
        self.embedding_size = embedding_size
        self.ent_total = ent_total
        self.rel_total = rel_total

        k1, k2, k3 = jax.random.split(key, 3)
        self.ent_embeddings = l2_normalize_rows(
            xavier_uniform(k1, (ent_total, embedding_size)))
        self.rel_embeddings = l2_normalize_rows(
            xavier_uniform(k2, (rel_total, embedding_size)))
        self.norm_embeddings = l2_normalize_rows(
            xavier_uniform(k3, (rel_total, embedding_size)))

        # Kernel-side tables: zero-pad the embedding dim to a 128-lane multiple
        # (exact no-op for L1/L2 scores) and the relation count to a sublane
        # multiple of 8.  rel and norm share the lookup index r, so they are
        # stacked as [R_pad, 2*Dp] and kept VMEM-resident by the kernel.
        D = embedding_size
        Dp = _round_up(D, 128)
        R_pad = max(8, _round_up(rel_total, 8))
        self.ent_table = jnp.pad(self.ent_embeddings, ((0, 0), (0, Dp - D)))
        relnorm = jnp.concatenate(
            [jnp.pad(self.rel_embeddings, ((0, 0), (0, Dp - D))),
             jnp.pad(self.norm_embeddings, ((0, 0), (0, Dp - D)))], axis=1)
        self.relnorm_table = jnp.pad(relnorm, ((0, R_pad - rel_total), (0, 0)))
        # TODO(synk): for v5e, store ent_table in bf16 (kernel already upcasts
        # to f32) to halve gathered bytes on the lowest-bandwidth HBM.

    def forward(self, h, t, r, **kwargs):
        return transh_score_pallas(
            self.ent_table, self.relnorm_table, h, t, r,
            l1_flag=self.L1_flag, **kwargs)

    # Pure-JAX reference (unfused, unfolded projections) for verification.
    def forward_ref(self, h, t, r):
        h_e = jnp.take(self.ent_embeddings, h, axis=0)
        t_e = jnp.take(self.ent_embeddings, t, axis=0)
        r_e = jnp.take(self.rel_embeddings, r, axis=0)
        w = jnp.take(self.norm_embeddings, r, axis=0)
        proj_h = h_e - jnp.sum(h_e * w, axis=1, keepdims=True) * w
        proj_t = t_e - jnp.sum(t_e * w, axis=1, keepdims=True) * w
        d = proj_h + r_e - proj_t
        if self.L1_flag:
            return jnp.sum(jnp.abs(d), axis=1)
        return jnp.sum(d * d, axis=1)

    # TODO(synk): evaluateHead / evaluateTail (all-entity ranking) are not
    # kernelized here; only the forward scoring path is implemented.


if __name__ == "__main__":
    embedding_size = 32
    ent_total = 64
    rel_total = 16

    def run_check(l1_flag, batch, seed, **kwargs):
        model = TransHModelPallas(l1_flag, embedding_size, ent_total, rel_total,
                                  jax.random.PRNGKey(0))
        kh, kt, kr = jax.random.split(jax.random.PRNGKey(seed), 3)
        h = jax.random.randint(kh, (batch,), 0, ent_total, dtype=jnp.int32)
        t = jax.random.randint(kt, (batch,), 0, ent_total, dtype=jnp.int32)
        r = jax.random.randint(kr, (batch,), 0, rel_total, dtype=jnp.int32)

        score = model.forward(h, t, r, **kwargs)
        jax.block_until_ready(score)
        ref = model.forward_ref(h, t, r)
        jax.block_until_ready(ref)

        assert score.shape == (batch,)
        assert jnp.allclose(score, ref, atol=1e-4, rtol=1e-4), (l1_flag, batch)

    # Single tile, L1 scoring, batch a multiple of 8.
    run_check(True, 8, 1)
    # Single tile, L2 scoring, batch not a multiple of 8 (padded-tail path).
    run_check(False, 11, 2)
    # Multi-tile 2-D grid (parallel outer x pipelined inner); odd tile count is
    # bumped to even; exercises the double-buffered cross-tile prefetch.
    run_check(True, 300, 3, max_tile_rows=64)
    run_check(False, 300, 4, max_tile_rows=64)

    print("KERNEL_OK")
</pallas_src>

<mosaic_0001>
module attributes {stable_mosaic.version = 11 : i64} {
  func.func @_transh_kernel(%arg0: i32, %arg1: i32, %arg2: memref<8xi32, #tpu.memory_space<smem>>, %arg3: memref<8xi32, #tpu.memory_space<smem>>, %arg4: memref<8x1xi32, #tpu.memory_space<vmem>>, %arg5: memref<16x256xf32, #tpu.memory_space<vmem>>, %arg6: memref<64x128xf32, #tpu.memory_space<any>>, %arg7: memref<1x1x8xf32, #tpu.memory_space<vmem>>, %arg8: memref<2x8x128xf32, #tpu.memory_space<vmem>>, %arg9: memref<2x8x128xf32, #tpu.memory_space<vmem>>, %arg10: memref<2x2x!tpu.dma_semaphore, #tpu.memory_space<semaphore_mem>>) attributes {dimension_semantics = [#tpu.dimension_semantics<parallel>, #tpu.dimension_semantics<arbitrary>], iteration_bounds = array<i64: 1, 1>, scalar_prefetch = 2 : i64, scratch_operands = 3 : i64, tpu.core_type = #tpu.core_type<tc>, window_params = [{transform_indices = @transform_0, window_bounds = array<i64: 8, 1>}, {pipeline_mode = #tpu.pipeline_mode<synchronous>, transform_indices = @transform_1, window_bounds = array<i64: 16, 256>}, {}, {transform_indices = @transform_3, window_bounds = array<i64: 1, 1, 8>}]} {
    %c0_i32 = arith.constant 0 : i32
    %0 = arith.cmpi eq, %arg1, %c0_i32 : i32
    %1 = arith.extui %0 : i1 to i32
    %c0_i32_0 = arith.constant 0 : i32
    %2 = arith.cmpi ne, %1, %c0_i32_0 : i32
    scf.if %2 {
      %c1_i32_30 = arith.constant 1 : i32
      %58 = arith.muli %arg0, %c1_i32_30 : i32
      %c8_i32 = arith.constant 8 : i32
      %59 = arith.muli %58, %c8_i32 : i32
      %c0_i32_31 = arith.constant 0 : i32
      %60 = arith.addi %59, %c0_i32_31 : i32
      %61 = arith.index_cast %60 : i32 to index
      %62 = memref.load %arg2[%61] : memref<8xi32, #tpu.memory_space<smem>>
      %63 = arith.addi %59, %c0_i32_31 : i32
      %64 = arith.index_cast %63 : i32 to index
      %65 = memref.load %arg3[%64] : memref<8xi32, #tpu.memory_space<smem>>
      %c0_i32_32 = arith.constant 0 : i32
      %c0_i32_33 = arith.constant 0 : i32
      %c0_i32_34 = arith.constant 0 : i32
      %c0_i32_35 = arith.constant 0 : i32
      %66 = tpu.memref_slice %arg6[%62, %c0_i32_35] : memref<64x128xf32, #tpu.memory_space<any>> -> memref<1x128xf32, #tpu.memory_space<any>>
      %c0_i32_36 = arith.constant 0 : i32
      %67 = tpu.memref_slice %arg8[%c0_i32_32, %c0_i32_31, %c0_i32_36] : memref<2x8x128xf32, #tpu.memory_space<vmem>> -> memref<1x1x128xf32, #tpu.memory_space<vmem>>
      %68 = tpu.memref_squeeze %67 : memref<1x1x128xf32, #tpu.memory_space<vmem>> -> memref<1x128xf32, #tpu.memory_space<vmem>>
      %69 = tpu.memref_slice %arg10[%c0_i32_33, %c0_i32_34] : memref<2x2x!tpu.dma_semaphore, #tpu.memory_space<semaphore_mem>> -> memref<1x1x!tpu.dma_semaphore, #tpu.memory_space<semaphore_mem>>
      %70 = tpu.memref_squeeze %69 : memref<1x1x!tpu.dma_semaphore, #tpu.memory_space<semaphore_mem>> -> memref<!tpu.dma_semaphore, #tpu.memory_space<semaphore_mem>>
      tpu.enqueue_dma source(%66 : memref<1x128xf32, #tpu.memory_space<any>>) target(%68 : memref<1x128xf32, #tpu.memory_space<vmem>>) target_semaphore(%70 : memref<!tpu.dma_semaphore, #tpu.memory_space<semaphore_mem>>)
      %c0_i32_37 = arith.constant 0 : i32
      %c1_i32_38 = arith.constant 1 : i32
      %c0_i32_39 = arith.constant 0 : i32
      %c0_i32_40 = arith.constant 0 : i32
      %71 = tpu.memref_slice %arg6[%65, %c0_i32_40] : memref<64x128xf32, #tpu.memory_space<any>> -> memref<1x128xf32, #tpu.memory_space<any>>
      %c0_i32_41 = arith.constant 0 : i32
      %72 = tpu.memref_slice %arg9[%c0_i32_37, %c0_i32_31, %c0_i32_41] : memref<2x8x128xf32, #tpu.memory_space<vmem>> -> memref<1x1x128xf32, #tpu.memory_space<vmem>>
      %73 = tpu.memref_squeeze %72 : memref<1x1x128xf32, #tpu.memory_space<vmem>> -> memref<1x128xf32, #tpu.memory_space<vmem>>
      %74 = tpu.memref_slice %arg10[%c1_i32_38, %c0_i32_39] : memref<2x2x!tpu.dma_semaphore, #tpu.memory_space<semaphore_mem>> -> memref<1x1x!tpu.dma_semaphore, #tpu.memory_space<semaphore_mem>>
      %75 = tpu.memref_squeeze %74 : memref<1x1x!tpu.dma_semaphore, #tpu.memory_space<semaphore_mem>> -> memref<!tpu.dma_semaphore, #tpu.memory_space<semaphore_mem>>
      tpu.enqueue_dma source(%71 : memref<1x128xf32, #tpu.memory_space<any>>) target(%73 : memref<1x128xf32, #tpu.memory_space<vmem>>) target_semaphore(%75 : memref<!tpu.dma_semaphore, #tpu.memory_space<semaphore_mem>>)
      %c1_i32_42 = arith.constant 1 : i32
      %76 = arith.addi %59, %c1_i32_42 : i32
      %77 = arith.index_cast %76 : i32 to index
      %78 = memref.load %arg2[%77] : memref<8xi32, #tpu.memory_space<smem>>
      %79 = arith.addi %59, %c1_i32_42 : i32
      %80 = arith.index_cast %79 : i32 to index
      %81 = memref.load %arg3[%80] : memref<8xi32, #tpu.memory_space<smem>>
      %c0_i32_43 = arith.constant 0 : i32
      %c0_i32_44 = arith.constant 0 : i32
      %c0_i32_45 = arith.constant 0 : i32
      %c0_i32_46 = arith.constant 0 : i32
      %82 = tpu.memref_slice %arg6[%78, %c0_i32_46] : memref<64x128xf32, #tpu.memory_space<any>> -> memref<1x128xf32, #tpu.memory_space<any>>
      %c0_i32_47 = arith.constant 0 : i32
      %83 = tpu.memref_slice %arg8[%c0_i32_43, %c1_i32_42, %c0_i32_47] : memref<2x8x128xf32, #tpu.memory_space<vmem>> -> memref<1x1x128xf32, #tpu.memory_space<vmem>>
      %84 = tpu.memref_squeeze %83 : memref<1x1x128xf32, #tpu.memory_space<vmem>> -> memref<1x128xf32, #tpu.memory_space<vmem>>
      %85 = tpu.memref_slice %arg10[%c0_i32_44, %c0_i32_45] : memref<2x2x!tpu.dma_semaphore, #tpu.memory_space<semaphore_mem>> -> memref<1x1x!tpu.dma_semaphore, #tpu.memory_space<semaphore_mem>>
      %86 = tpu.memref_squeeze %85 : memref<1x1x!tpu.dma_semaphore, #tpu.memory_space<semaphore_mem>> -> memref<!tpu.dma_semaphore, #tpu.memory_space<semaphore_mem>>
      tpu.enqueue_dma source(%82 : memref<1x128xf32, #tpu.memory_space<any>>) target(%84 : memref<1x128xf32, #tpu.memory_space<vmem>>) target_semaphore(%86 : memref<!tpu.dma_semaphore, #tpu.memory_space<semaphore_mem>>)
      %c0_i32_48 = arith.constant 0 : i32
      %c1_i32_49 = arith.constant 1 : i32
      %c0_i32_50 = arith.constant 0 : i32
      %c0_i32_51 = arith.constant 0 : i32
      %87 = tpu.memref_slice %arg6[%81, %c0_i32_51] : memref<64x128xf32, #tpu.memory_space<any>> -> memref<1x128xf32, #tpu.memory_space<any>>
      %c0_i32_52 = arith.constant 0 : i32
      %88 = tpu.memref_slice %arg9[%c0_i32_48, %c1_i32_42, %c0_i32_52] : memref<2x8x128xf32, #tpu.memory_space<vmem>> -> memref<1x1x128xf32, #tpu.memory_space<vmem>>
      %89 = tpu.memref_squeeze %88 : memref<1x1x128xf32, #tpu.memory_space<vmem>> -> memref<1x128xf32, #tpu.memory_space<vmem>>
      %90 = tpu.memref_slice %arg10[%c1_i32_49, %c0_i32_50] : memref<2x2x!tpu.dma_semaphore, #tpu.memory_space<semaphore_mem>> -> memref<1x1x!tpu.dma_semaphore, #tpu.memory_space<semaphore_mem>>
      %91 = tpu.memref_squeeze %90 : memref<1x1x!tpu.dma_semaphore, #tpu.memory_space<semaphore_mem>> -> memref<!tpu.dma_semaphore, #tpu.memory_space<semaphore_mem>>
      tpu.enqueue_dma source(%87 : memref<1x128xf32, #tpu.memory_space<any>>) target(%89 : memref<1x128xf32, #tpu.memory_space<vmem>>) target_semaphore(%91 : memref<!tpu.dma_semaphore, #tpu.memory_space<semaphore_mem>>)
      %c2_i32_53 = arith.constant 2 : i32
      %92 = arith.addi %59, %c2_i32_53 : i32
      %93 = arith.index_cast %92 : i32 to index
      %94 = memref.load %arg2[%93] : memref<8xi32, #tpu.memory_space<smem>>
      %95 = arith.addi %59, %c2_i32_53 : i32
      %96 = arith.index_cast %95 : i32 to index
      %97 = memref.load %arg3[%96] : memref<8xi32, #tpu.memory_space<smem>>
      %c0_i32_54 = arith.constant 0 : i32
      %c0_i32_55 = arith.constant 0 : i32
      %c0_i32_56 = arith.constant 0 : i32
      %c0_i32_57 = arith.constant 0 : i32
      %98 = tpu.memref_slice %arg6[%94, %c0_i32_57] : memref<64x128xf32, #tpu.memory_space<any>> -> memref<1x128xf32, #tpu.memory_space<any>>
      %c0_i32_58 = arith.constant 0 : i32
      %99 = tpu.memref_slice %arg8[%c0_i32_54, %c2_i32_53, %c0_i32_58] : memref<2x8x128xf32, #tpu.memory_space<vmem>> -> memref<1x1x128xf32, #tpu.memory_space<vmem>>
      %100 = tpu.memref_squeeze %99 : memref<1x1x128xf32, #tpu.memory_space<vmem>> -> memref<1x128xf32, #tpu.memory_space<vmem>>
      %101 = tpu.memref_slice %arg10[%c0_i32_55, %c0_i32_56] : memref<2x2x!tpu.dma_semaphore, #tpu.memory_space<semaphore_mem>> -> memref<1x1x!tpu.dma_semaphore, #tpu.memory_space<semaphore_mem>>
      %102 = tpu.memref_squeeze %101 : memref<1x1x!tpu.dma_semaphore, #tpu.memory_space<semaphore_mem>> -> memref<!tpu.dma_semaphore, #tpu.memory_space<semaphore_mem>>
      tpu.enqueue_dma source(%98 : memref<1x128xf32, #tpu.memory_space<any>>) target(%100 : memref<1x128xf32, #tpu.memory_space<vmem>>) target_semaphore(%102 : memref<!tpu.dma_semaphore, #tpu.memory_space<semaphore_mem>>)
      %c0_i32_59 = arith.constant 0 : i32
      %c1_i32_60 = arith.constant 1 : i32
      %c0_i32_61 = arith.constant 0 : i32
      %c0_i32_62 = arith.constant 0 : i32
      %103 = tpu.memref_slice %arg6[%97, %c0_i32_62] : memref<64x128xf32, #tpu.memory_space<any>> -> memref<1x128xf32, #tpu.memory_space<any>>
      %c0_i32_63 = arith.constant 0 : i32
      %104 = tpu.memref_slice %arg9[%c0_i32_59, %c2_i32_53, %c0_i32_63] : memref<2x8x128xf32, #tpu.memory_space<vmem>> -> memref<1x1x128xf32, #tpu.memory_space<vmem>>
      %105 = tpu.memref_squeeze %104 : memref<1x1x128xf32, #tpu.memory_space<vmem>> -> memref<1x128xf32, #tpu.memory_space<vmem>>
      %106 = tpu.memref_slice %arg10[%c1_i32_60, %c0_i32_61] : memref<2x2x!tpu.dma_semaphore, #tpu.memory_space<semaphore_mem>> -> memref<1x1x!tpu.dma_semaphore, #tpu.memory_space<semaphore_mem>>
      %107 = tpu.memref_squeeze %106 : memref<1x1x!tpu.dma_semaphore, #tpu.memory_space<semaphore_mem>> -> memref<!tpu.dma_semaphore, #tpu.memory_space<semaphore_mem>>
      tpu.enqueue_dma source(%103 : memref<1x128xf32, #tpu.memory_space<any>>) target(%105 : memref<1x128xf32, #tpu.memory_space<vmem>>) target_semaphore(%107 : memref<!tpu.dma_semaphore, #tpu.memory_space<semaphore_mem>>)
      %c3_i32 = arith.constant 3 : i32
      %108 = arith.addi %59, %c3_i32 : i32
      %109 = arith.index_cast %108 : i32 to index
      %110 = memref.load %arg2[%109] : memref<8xi32, #tpu.memory_space<smem>>
      %111 = arith.addi %59, %c3_i32 : i32
      %112 = arith.index_cast %111 : i32 to index
      %113 = memref.load %arg3[%112] : memref<8xi32, #tpu.memory_space<smem>>
      %c0_i32_64 = arith.constant 0 : i32
      %c0_i32_65 = arith.constant 0 : i32
      %c0_i32_66 = arith.constant 0 : i32
      %c0_i32_67 = arith.constant 0 : i32
      %114 = tpu.memref_slice %arg6[%110, %c0_i32_67] : memref<64x128xf32, #tpu.memory_space<any>> -> memref<1x128xf32, #tpu.memory_space<any>>
      %c0_i32_68 = arith.constant 0 : i32
      %115 = tpu.memref_slice %arg8[%c0_i32_64, %c3_i32, %c0_i32_68] : memref<2x8x128xf32, #tpu.memory_space<vmem>> -> memref<1x1x128xf32, #tpu.memory_space<vmem>>
      %116 = tpu.memref_squeeze %115 : memref<1x1x128xf32, #tpu.memory_space<vmem>> -> memref<1x128xf32, #tpu.memory_space<vmem>>
      %117 = tpu.memref_slice %arg10[%c0_i32_65, %c0_i32_66] : memref<2x2x!tpu.dma_semaphore, #tpu.memory_space<semaphore_mem>> -> memref<1x1x!tpu.dma_semaphore, #tpu.memory_space<semaphore_mem>>
      %118 = tpu.memref_squeeze %117 : memref<1x1x!tpu.dma_semaphore, #tpu.memory_space<semaphore_mem>> -> memref<!tpu.dma_semaphore, #tpu.memory_space<semaphore_mem>>
      tpu.enqueue_dma source(%114 : memref<1x128xf32, #tpu.memory_space<any>>) target(%116 : memref<1x128xf32, #tpu.memory_space<vmem>>) target_semaphore(%118 : memref<!tpu.dma_semaphore, #tpu.memory_space<semaphore_mem>>)
      %c0_i32_69 = arith.constant 0 : i32
      %c1_i32_70 = arith.constant 1 : i32
      %c0_i32_71 = arith.constant 0 : i32
      %c0_i32_72 = arith.constant 0 : i32
      %119 = tpu.memref_slice %arg6[%113, %c0_i32_72] : memref<64x128xf32, #tpu.memory_space<any>> -> memref<1x128xf32, #tpu.memory_space<any>>
      %c0_i32_73 = arith.constant 0 : i32
      %120 = tpu.memref_slice %arg9[%c0_i32_69, %c3_i32, %c0_i32_73] : memref<2x8x128xf32, #tpu.memory_space<vmem>> -> memref<1x1x128xf32, #tpu.memory_space<vmem>>
      %121 = tpu.memref_squeeze %120 : memref<1x1x128xf32, #tpu.memory_space<vmem>> -> memref<1x128xf32, #tpu.memory_space<vmem>>
      %122 = tpu.memref_slice %arg10[%c1_i32_70, %c0_i32_71] : memref<2x2x!tpu.dma_semaphore, #tpu.memory_space<semaphore_mem>> -> memref<1x1x!tpu.dma_semaphore, #tpu.memory_space<semaphore_mem>>
      %123 = tpu.memref_squeeze %122 : memref<1x1x!tpu.dma_semaphore, #tpu.memory_space<semaphore_mem>> -> memref<!tpu.dma_semaphore, #tpu.memory_space<semaphore_mem>>
      tpu.enqueue_dma source(%119 : memref<1x128xf32, #tpu.memory_space<any>>) target(%121 : memref<1x128xf32, #tpu.memory_space<vmem>>) target_semaphore(%123 : memref<!tpu.dma_semaphore, #tpu.memory_space<semaphore_mem>>)
      %c4_i32 = arith.constant 4 : i32
      %124 = arith.addi %59, %c4_i32 : i32
      %125 = arith.index_cast %124 : i32 to index
      %126 = memref.load %arg2[%125] : memref<8xi32, #tpu.memory_space<smem>>
      %127 = arith.addi %59, %c4_i32 : i32
      %128 = arith.index_cast %127 : i32 to index
      %129 = memref.load %arg3[%128] : memref<8xi32, #tpu.memory_space<smem>>
      %c0_i32_74 = arith.constant 0 : i32
      %c0_i32_75 = arith.constant 0 : i32
      %c0_i32_76 = arith.constant 0 : i32
      %c0_i32_77 = arith.constant 0 : i32
      %130 = tpu.memref_slice %arg6[%126, %c0_i32_77] : memref<64x128xf32, #tpu.memory_space<any>> -> memref<1x128xf32, #tpu.memory_space<any>>
      %c0_i32_78 = arith.constant 0 : i32
      %131 = tpu.memref_slice %arg8[%c0_i32_74, %c4_i32, %c0_i32_78] : memref<2x8x128xf32, #tpu.memory_space<vmem>> -> memref<1x1x128xf32, #tpu.memory_space<vmem>>
      %132 = tpu.memref_squeeze %131 : memref<1x1x128xf32, #tpu.memory_space<vmem>> -> memref<1x128xf32, #tpu.memory_space<vmem>>
      %133 = tpu.memref_slice %arg10[%c0_i32_75, %c0_i32_76] : memref<2x2x!tpu.dma_semaphore, #tpu.memory_space<semaphore_mem>> -> memref<1x1x!tpu.dma_semaphore, #tpu.memory_space<semaphore_mem>>
      %134 = tpu.memref_squeeze %133 : memref<1x1x!tpu.dma_semaphore, #tpu.memory_space<semaphore_mem>> -> memref<!tpu.dma_semaphore, #tpu.memory_space<semaphore_mem>>
      tpu.enqueue_dma source(%130 : memref<1x128xf32, #tpu.memory_space<any>>) target(%132 : memref<1x128xf32, #tpu.memory_space<vmem>>) target_semaphore(%134 : memref<!tpu.dma_semaphore, #tpu.memory_space<semaphore_mem>>)
      %c0_i32_79 = arith.constant 0 : i32
      %c1_i32_80 = arith.constant 1 : i32
      %c0_i32_81 = arith.constant 0 : i32
      %c0_i32_82 = arith.constant 0 : i32
      %135 = tpu.memref_slice %arg6[%129, %c0_i32_82] : memref<64x128xf32, #tpu.memory_space<any>> -> memref<1x128xf32, #tpu.memory_space<any>>
      %c0_i32_83 = arith.constant 0 : i32
      %136 = tpu.memref_slice %arg9[%c0_i32_79, %c4_i32, %c0_i32_83] : memref<2x8x128xf32, #tpu.memory_space<vmem>> -> memref<1x1x128xf32, #tpu.memory_space<vmem>>
      %137 = tpu.memref_squeeze %136 : memref<1x1x128xf32, #tpu.memory_space<vmem>> -> memref<1x128xf32, #tpu.memory_space<vmem>>
      %138 = tpu.memref_slice %arg10[%c1_i32_80, %c0_i32_81] : memref<2x2x!tpu.dma_semaphore, #tpu.memory_space<semaphore_mem>> -> memref<1x1x!tpu.dma_semaphore, #tpu.memory_space<semaphore_mem>>
      %139 = tpu.memref_squeeze %138 : memref<1x1x!tpu.dma_semaphore, #tpu.memory_space<semaphore_mem>> -> memref<!tpu.dma_semaphore, #tpu.memory_space<semaphore_mem>>
      tpu.enqueue_dma source(%135 : memref<1x128xf32, #tpu.memory_space<any>>) target(%137 : memref<1x128xf32, #tpu.memory_space<vmem>>) target_semaphore(%139 : memref<!tpu.dma_semaphore, #tpu.memory_space<semaphore_mem>>)
      %c5_i32 = arith.constant 5 : i32
      %140 = arith.addi %59, %c5_i32 : i32
      %141 = arith.index_cast %140 : i32 to index
      %142 = memref.load %arg2[%141] : memref<8xi32, #tpu.memory_space<smem>>
      %143 = arith.addi %59, %c5_i32 : i32
      %144 = arith.index_cast %143 : i32 to index
      %145 = memref.load %arg3[%144] : memref<8xi32, #tpu.memory_space<smem>>
      %c0_i32_84 = arith.constant 0 : i32
      %c0_i32_85 = arith.constant 0 : i32
      %c0_i32_86 = arith.constant 0 : i32
      %c0_i32_87 = arith.constant 0 : i32
      %146 = tpu.memref_slice %arg6[%142, %c0_i32_87] : memref<64x128xf32, #tpu.memory_space<any>> -> memref<1x128xf32, #tpu.memory_space<any>>
      %c0_i32_88 = arith.constant 0 : i32
      %147 = tpu.memref_slice %arg8[%c0_i32_84, %c5_i32, %c0_i32_88] : memref<2x8x128xf32, #tpu.memory_space<vmem>> -> memref<1x1x128xf32, #tpu.memory_space<vmem>>
      %148 = tpu.memref_squeeze %147 : memref<1x1x128xf32, #tpu.memory_space<vmem>> -> memref<1x128xf32, #tpu.memory_space<vmem>>
      %149 = tpu.memref_slice %arg10[%c0_i32_85, %c0_i32_86] : memref<2x2x!tpu.dma_semaphore, #tpu.memory_space<semaphore_mem>> -> memref<1x1x!tpu.dma_semaphore, #tpu.memory_space<semaphore_mem>>
      %150 = tpu.memref_squeeze %149 : memref<1x1x!tpu.dma_semaphore, #tpu.memory_space<semaphore_mem>> -> memref<!tpu.dma_semaphore, #tpu.memory_space<semaphore_mem>>
      tpu.enqueue_dma source(%146 : memref<1x128xf32, #tpu.memory_space<any>>) target(%148 : memref<1x128xf32, #tpu.memory_space<vmem>>) target_semaphore(%150 : memref<!tpu.dma_semaphore, #tpu.memory_space<semaphore_mem>>)
      %c0_i32_89 = arith.constant 0 : i32
      %c1_i32_90 = arith.constant 1 : i32
      %c0_i32_91 = arith.constant 0 : i32
      %c0_i32_92 = arith.constant 0 : i32
      %151 = tpu.memref_slice %arg6[%145, %c0_i32_92] : memref<64x128xf32, #tpu.memory_space<any>> -> memref<1x128xf32, #tpu.memory_space<any>>
      %c0_i32_93 = arith.constant 0 : i32
      %152 = tpu.memref_slice %arg9[%c0_i32_89, %c5_i32, %c0_i32_93] : memref<2x8x128xf32, #tpu.memory_space<vmem>> -> memref<1x1x128xf32, #tpu.memory_space<vmem>>
      %153 = tpu.memref_squeeze %152 : memref<1x1x128xf32, #tpu.memory_space<vmem>> -> memref<1x128xf32, #tpu.memory_space<vmem>>
      %154 = tpu.memref_slice %arg10[%c1_i32_90, %c0_i32_91] : memref<2x2x!tpu.dma_semaphore, #tpu.memory_space<semaphore_mem>> -> memref<1x1x!tpu.dma_semaphore, #tpu.memory_space<semaphore_mem>>
      %155 = tpu.memref_squeeze %154 : memref<1x1x!tpu.dma_semaphore, #tpu.memory_space<semaphore_mem>> -> memref<!tpu.dma_semaphore, #tpu.memory_space<semaphore_mem>>
      tpu.enqueue_dma source(%151 : memref<1x128xf32, #tpu.memory_space<any>>) target(%153 : memref<1x128xf32, #tpu.memory_space<vmem>>) target_semaphore(%155 : memref<!tpu.dma_semaphore, #tpu.memory_space<semaphore_mem>>)
      %c6_i32 = arith.constant 6 : i32
      %156 = arith.addi %59, %c6_i32 : i32
      %157 = arith.index_cast %156 : i32 to index
      %158 = memref.load %arg2[%157] : memref<8xi32, #tpu.memory_space<smem>>
      %159 = arith.addi %59, %c6_i32 : i32
      %160 = arith.index_cast %159 : i32 to index
      %161 = memref.load %arg3[%160] : memref<8xi32, #tpu.memory_space<smem>>
      %c0_i32_94 = arith.constant 0 : i32
      %c0_i32_95 = arith.constant 0 : i32
      %c0_i32_96 = arith.constant 0 : i32
      %c0_i32_97 = arith.constant 0 : i32
      %162 = tpu.memref_slice %arg6[%158, %c0_i32_97] : memref<64x128xf32, #tpu.memory_space<any>> -> memref<1x128xf32, #tpu.memory_space<any>>
      %c0_i32_98 = arith.constant 0 : i32
      %163 = tpu.memref_slice %arg8[%c0_i32_94, %c6_i32, %c0_i32_98] : memref<2x8x128xf32, #tpu.memory_space<vmem>> -> memref<1x1x128xf32, #tpu.memory_space<vmem>>
      %164 = tpu.memref_squeeze %163 : memref<1x1x128xf32, #tpu.memory_space<vmem>> -> memref<1x128xf32, #tpu.memory_space<vmem>>
      %165 = tpu.memref_slice %arg10[%c0_i32_95, %c0_i32_96] : memref<2x2x!tpu.dma_semaphore, #tpu.memory_space<semaphore_mem>> -> memref<1x1x!tpu.dma_semaphore, #tpu.memory_space<semaphore_mem>>
      %166 = tpu.memref_squeeze %165 : memref<1x1x!tpu.dma_semaphore, #tpu.memory_space<semaphore_mem>> -> memref<!tpu.dma_semaphore, #tpu.memory_space<semaphore_mem>>
      tpu.enqueue_dma source(%162 : memref<1x128xf32, #tpu.memory_space<any>>) target(%164 : memref<1x128xf32, #tpu.memory_space<vmem>>) target_semaphore(%166 : memref<!tpu.dma_semaphore, #tpu.memory_space<semaphore_mem>>)
      %c0_i32_99 = arith.constant 0 : i32
      %c1_i32_100 = arith.constant 1 : i32
      %c0_i32_101 = arith.constant 0 : i32
      %c0_i32_102 = arith.constant 0 : i32
      %167 = tpu.memref_slice %arg6[%161, %c0_i32_102] : memref<64x128xf32, #tpu.memory_space<any>> -> memref<1x128xf32, #tpu.memory_space<any>>
      %c0_i32_103 = arith.constant 0 : i32
      %168 = tpu.memref_slice %arg9[%c0_i32_99, %c6_i32, %c0_i32_103] : memref<2x8x128xf32, #tpu.memory_space<vmem>> -> memref<1x1x128xf32, #tpu.memory_space<vmem>>
      %169 = tpu.memref_squeeze %168 : memref<1x1x128xf32, #tpu.memory_space<vmem>> -> memref<1x128xf32, #tpu.memory_space<vmem>>
      %170 = tpu.memref_slice %arg10[%c1_i32_100, %c0_i32_101] : memref<2x2x!tpu.dma_semaphore, #tpu.memory_space<semaphore_mem>> -> memref<1x1x!tpu.dma_semaphore, #tpu.memory_space<semaphore_mem>>
      %171 = tpu.memref_squeeze %170 : memref<1x1x!tpu.dma_semaphore, #tpu.memory_space<semaphore_mem>> -> memref<!tpu.dma_semaphore, #tpu.memory_space<semaphore_mem>>
      tpu.enqueue_dma source(%167 : memref<1x128xf32, #tpu.memory_space<any>>) target(%169 : memref<1x128xf32, #tpu.memory_space<vmem>>) target_semaphore(%171 : memref<!tpu.dma_semaphore, #tpu.memory_space<semaphore_mem>>)
      %c7_i32 = arith.constant 7 : i32
      %172 = arith.addi %59, %c7_i32 : i32
      %173 = arith.index_cast %172 : i32 to index
      %174 = memref.load %arg2[%173] : memref<8xi32, #tpu.memory_space<smem>>
      %175 = arith.addi %59, %c7_i32 : i32
      %176 = arith.index_cast %175 : i32 to index
      %177 = memref.load %arg3[%176] : memref<8xi32, #tpu.memory_space<smem>>
      %c0_i32_104 = arith.constant 0 : i32
      %c0_i32_105 = arith.constant 0 : i32
      %c0_i32_106 = arith.constant 0 : i32
      %c0_i32_107 = arith.constant 0 : i32
      %178 = tpu.memref_slice %arg6[%174, %c0_i32_107] : memref<64x128xf32, #tpu.memory_space<any>> -> memref<1x128xf32, #tpu.memory_space<any>>
      %c0_i32_108 = arith.constant 0 : i32
      %179 = tpu.memref_slice %arg8[%c0_i32_104, %c7_i32, %c0_i32_108] : memref<2x8x128xf32, #tpu.memory_space<vmem>> -> memref<1x1x128xf32, #tpu.memory_space<vmem>>
      %180 = tpu.memref_squeeze %179 : memref<1x1x128xf32, #tpu.memory_space<vmem>> -> memref<1x128xf32, #tpu.memory_space<vmem>>
      %181 = tpu.memref_slice %arg10[%c0_i32_105, %c0_i32_106] : memref<2x2x!tpu.dma_semaphore, #tpu.memory_space<semaphore_mem>> -> memref<1x1x!tpu.dma_semaphore, #tpu.memory_space<semaphore_mem>>
      %182 = tpu.memref_squeeze %181 : memref<1x1x!tpu.dma_semaphore, #tpu.memory_space<semaphore_mem>> -> memref<!tpu.dma_semaphore, #tpu.memory_space<semaphore_mem>>
      tpu.enqueue_dma source(%178 : memref<1x128xf32, #tpu.memory_space<any>>) target(%180 : memref<1x128xf32, #tpu.memory_space<vmem>>) target_semaphore(%182 : memref<!tpu.dma_semaphore, #tpu.memory_space<semaphore_mem>>)
      %c0_i32_109 = arith.constant 0 : i32
      %c1_i32_110 = arith.constant 1 : i32
      %c0_i32_111 = arith.constant 0 : i32
      %c0_i32_112 = arith.constant 0 : i32
      %183 = tpu.memref_slice %arg6[%177, %c0_i32_112] : memref<64x128xf32, #tpu.memory_space<any>> -> memref<1x128xf32, #tpu.memory_space<any>>
      %c0_i32_113 = arith.constant 0 : i32
      %184 = tpu.memref_slice %arg9[%c0_i32_109, %c7_i32, %c0_i32_113] : memref<2x8x128xf32, #tpu.memory_space<vmem>> -> memref<1x1x128xf32, #tpu.memory_space<vmem>>
      %185 = tpu.memref_squeeze %184 : memref<1x1x128xf32, #tpu.memory_space<vmem>> -> memref<1x128xf32, #tpu.memory_space<vmem>>
      %186 = tpu.memref_slice %arg10[%c1_i32_110, %c0_i32_111] : memref<2x2x!tpu.dma_semaphore, #tpu.memory_space<semaphore_mem>> -> memref<1x1x!tpu.dma_semaphore, #tpu.memory_space<semaphore_mem>>
      %187 = tpu.memref_squeeze %186 : memref<1x1x!tpu.dma_semaphore, #tpu.memory_space<semaphore_mem>> -> memref<!tpu.dma_semaphore, #tpu.memory_space<semaphore_mem>>
      tpu.enqueue_dma source(%183 : memref<1x128xf32, #tpu.memory_space<any>>) target(%185 : memref<1x128xf32, #tpu.memory_space<vmem>>) target_semaphore(%187 : memref<!tpu.dma_semaphore, #tpu.memory_space<semaphore_mem>>)
      %c8_i32_114 = arith.constant 8 : i32
    } else {
    }
    %c1_i32 = arith.constant 1 : i32
    %3 = arith.addi %arg1, %c1_i32 : i32
    %c1_i32_1 = arith.constant 1 : i32
    %4 = arith.cmpi slt, %3, %c1_i32_1 : i32
    %5 = arith.extui %4 : i1 to i32
    %c0_i32_2 = arith.constant 0 : i32
    %6 = arith.cmpi ne, %5, %c0_i32_2 : i32
    scf.if %6 {
      %c1_i32_30 = arith.constant 1 : i32
      %58 = arith.muli %arg0, %c1_i32_30 : i32
      %59 = arith.addi %58, %arg1 : i32
      %c1_i32_31 = arith.constant 1 : i32
      %60 = arith.addi %59, %c1_i32_31 : i32
      %c1_i32_32 = arith.constant 1 : i32
      %61 = arith.addi %arg1, %c1_i32_32 : i32
      %c2_i32_33 = arith.constant 2 : i32
      %c0_i32_34 = arith.constant 0 : i32
      %62 = arith.cmpi eq, %c2_i32_33, %c0_i32_34 : i32
      %c1_i32_35 = arith.constant 1 : i32
      %63 = arith.select %62, %c1_i32_35, %c2_i32_33 : i32
      %64 = arith.remsi %61, %63 : i32
      %c0_i32_36 = arith.constant 0 : i32
      %65 = arith.cmpi ne, %64, %c0_i32_36 : i32
      %c0_i32_37 = arith.constant 0 : i32
      %66 = arith.cmpi slt, %64, %c0_i32_37 : i32
      %c0_i32_38 = arith.constant 0 : i32
      %67 = arith.cmpi slt, %63, %c0_i32_38 : i32
      %68 = arith.xori %66, %67 : i1
      %69 = arith.andi %68, %65 : i1
      %70 = arith.addi %64, %63 : i32
      %71 = arith.select %69, %70, %64 : i32
      %c8_i32 = arith.constant 8 : i32
      %72 = arith.muli %60, %c8_i32 : i32
      %c0_i32_39 = arith.constant 0 : i32
      %73 = arith.addi %72, %c0_i32_39 : i32
      %74 = arith.index_cast %73 : i32 to index
      %75 = memref.load %arg2[%74] : memref<8xi32, #tpu.memory_space<smem>>
      %76 = arith.addi %72, %c0_i32_39 : i32
      %77 = arith.index_cast %76 : i32 to index
      %78 = memref.load %arg3[%77] : memref<8xi32, #tpu.memory_space<smem>>
      %c0_i32_40 = arith.constant 0 : i32
      %c0_i32_41 = arith.constant 0 : i32
      %79 = tpu.memref_slice %arg6[%75, %c0_i32_41] : memref<64x128xf32, #tpu.memory_space<any>> -> memref<1x128xf32, #tpu.memory_space<any>>
      %c0_i32_42 = arith.constant 0 : i32
      %80 = tpu.memref_slice %arg8[%71, %c0_i32_39, %c0_i32_42] : memref<2x8x128xf32, #tpu.memory_space<vmem>> -> memref<1x1x128xf32, #tpu.memory_space<vmem>>
      %81 = tpu.memref_squeeze %80 : memref<1x1x128xf32, #tpu.memory_space<vmem>> -> memref<1x128xf32, #tpu.memory_space<vmem>>
      %82 = tpu.memref_slice %arg10[%c0_i32_40, %71] : memref<2x2x!tpu.dma_semaphore, #tpu.memory_space<semaphore_mem>> -> memref<1x1x!tpu.dma_semaphore, #tpu.memory_space<semaphore_mem>>
      %83 = tpu.memref_squeeze %82 : memref<1x1x!tpu.dma_semaphore, #tpu.memory_space<semaphore_mem>> -> memref<!tpu.dma_semaphore, #tpu.memory_space<semaphore_mem>>
      tpu.enqueue_dma source(%79 : memref<1x128xf32, #tpu.memory_space<any>>) target(%81 : memref<1x128xf32, #tpu.memory_space<vmem>>) target_semaphore(%83 : memref<!tpu.dma_semaphore, #tpu.memory_space<semaphore_mem>>)
      %c1_i32_43 = arith.constant 1 : i32
      %c0_i32_44 = arith.constant 0 : i32
      %84 = tpu.memref_slice %arg6[%78, %c0_i32_44] : memref<64x128xf32, #tpu.memory_space<any>> -> memref<1x128xf32, #tpu.memory_space<any>>
      %c0_i32_45 = arith.constant 0 : i32
      %85 = tpu.memref_slice %arg9[%71, %c0_i32_39, %c0_i32_45] : memref<2x8x128xf32, #tpu.memory_space<vmem>> -> memref<1x1x128xf32, #tpu.memory_space<vmem>>
      %86 = tpu.memref_squeeze %85 : memref<1x1x128xf32, #tpu.memory_space<vmem>> -> memref<1x128xf32, #tpu.memory_space<vmem>>
      %87 = tpu.memref_slice %arg10[%c1_i32_43, %71] : memref<2x2x!tpu.dma_semaphore, #tpu.memory_space<semaphore_mem>> -> memref<1x1x!tpu.dma_semaphore, #tpu.memory_space<semaphore_mem>>
      %88 = tpu.memref_squeeze %87 : memref<1x1x!tpu.dma_semaphore, #tpu.memory_space<semaphore_mem>> -> memref<!tpu.dma_semaphore, #tpu.memory_space<semaphore_mem>>
      tpu.enqueue_dma source(%84 : memref<1x128xf32, #tpu.memory_space<any>>) target(%86 : memref<1x128xf32, #tpu.memory_space<vmem>>) target_semaphore(%88 : memref<!tpu.dma_semaphore, #tpu.memory_space<semaphore_mem>>)
      %c1_i32_46 = arith.constant 1 : i32
      %89 = arith.addi %72, %c1_i32_46 : i32
      %90 = arith.index_cast %89 : i32 to index
      %91 = memref.load %arg2[%90] : memref<8xi32, #tpu.memory_space<smem>>
      %92 = arith.addi %72, %c1_i32_46 : i32
      %93 = arith.index_cast %92 : i32 to index
      %94 = memref.load %arg3[%93] : memref<8xi32, #tpu.memory_space<smem>>
      %c0_i32_47 = arith.constant 0 : i32
      %c0_i32_48 = arith.constant 0 : i32
      %95 = tpu.memref_slice %arg6[%91, %c0_i32_48] : memref<64x128xf32, #tpu.memory_space<any>> -> memref<1x128xf32, #tpu.memory_space<any>>
      %c0_i32_49 = arith.constant 0 : i32
      %96 = tpu.memref_slice %arg8[%71, %c1_i32_46, %c0_i32_49] : memref<2x8x128xf32, #tpu.memory_space<vmem>> -> memref<1x1x128xf32, #tpu.memory_space<vmem>>
      %97 = tpu.memref_squeeze %96 : memref<1x1x128xf32, #tpu.memory_space<vmem>> -> memref<1x128xf32, #tpu.memory_space<vmem>>
      %98 = tpu.memref_slice %arg10[%c0_i32_47, %71] : memref<2x2x!tpu.dma_semaphore, #tpu.memory_space<semaphore_mem>> -> memref<1x1x!tpu.dma_semaphore, #tpu.memory_space<semaphore_mem>>
      %99 = tpu.memref_squeeze %98 : memref<1x1x!tpu.dma_semaphore, #tpu.memory_space<semaphore_mem>> -> memref<!tpu.dma_semaphore, #tpu.memory_space<semaphore_mem>>
      tpu.enqueue_dma source(%95 : memref<1x128xf32, #tpu.memory_space<any>>) target(%97 : memref<1x128xf32, #tpu.memory_space<vmem>>) target_semaphore(%99 : memref<!tpu.dma_semaphore, #tpu.memory_space<semaphore_mem>>)
      %c1_i32_50 = arith.constant 1 : i32
      %c0_i32_51 = arith.constant 0 : i32
      %100 = tpu.memref_slice %arg6[%94, %c0_i32_51] : memref<64x128xf32, #tpu.memory_space<any>> -> memref<1x128xf32, #tpu.memory_space<any>>
      %c0_i32_52 = arith.constant 0 : i32
      %101 = tpu.memref_slice %arg9[%71, %c1_i32_46, %c0_i32_52] : memref<2x8x128xf32, #tpu.memory_space<vmem>> -> memref<1x1x128xf32, #tpu.memory_space<vmem>>
      %102 = tpu.memref_squeeze %101 : memref<1x1x128xf32, #tpu.memory_space<vmem>> -> memref<1x128xf32, #tpu.memory_space<vmem>>
      %103 = tpu.memref_slice %arg10[%c1_i32_50, %71] : memref<2x2x!tpu.dma_semaphore, #tpu.memory_space<semaphore_mem>> -> memref<1x1x!tpu.dma_semaphore, #tpu.memory_space<semaphore_mem>>
      %104 = tpu.memref_squeeze %103 : memref<1x1x!tpu.dma_semaphore, #tpu.memory_space<semaphore_mem>> -> memref<!tpu.dma_semaphore, #tpu.memory_space<semaphore_mem>>
      tpu.enqueue_dma source(%100 : memref<1x128xf32, #tpu.memory_space<any>>) target(%102 : memref<1x128xf32, #tpu.memory_space<vmem>>) target_semaphore(%104 : memref<!tpu.dma_semaphore, #tpu.memory_space<semaphore_mem>>)
      %c2_i32_53 = arith.constant 2 : i32
      %105 = arith.addi %72, %c2_i32_53 : i32
      %106 = arith.index_cast %105 : i32 to index
      %107 = memref.load %arg2[%106] : memref<8xi32, #tpu.memory_space<smem>>
      %108 = arith.addi %72, %c2_i32_53 : i32
      %109 = arith.index_cast %108 : i32 to index
      %110 = memref.load %arg3[%109] : memref<8xi32, #tpu.memory_space<smem>>
      %c0_i32_54 = arith.constant 0 : i32
      %c0_i32_55 = arith.constant 0 : i32
      %111 = tpu.memref_slice %arg6[%107, %c0_i32_55] : memref<64x128xf32, #tpu.memory_space<any>> -> memref<1x128xf32, #tpu.memory_space<any>>
      %c0_i32_56 = arith.constant 0 : i32
      %112 = tpu.memref_slice %arg8[%71, %c2_i32_53, %c0_i32_56] : memref<2x8x128xf32, #tpu.memory_space<vmem>> -> memref<1x1x128xf32, #tpu.memory_space<vmem>>
      %113 = tpu.memref_squeeze %112 : memref<1x1x128xf32, #tpu.memory_space<vmem>> -> memref<1x128xf32, #tpu.memory_space<vmem>>
      %114 = tpu.memref_slice %arg10[%c0_i32_54, %71] : memref<2x2x!tpu.dma_semaphore, #tpu.memory_space<semaphore_mem>> -> memref<1x1x!tpu.dma_semaphore, #tpu.memory_space<semaphore_mem>>
      %115 = tpu.memref_squeeze %114 : memref<1x1x!tpu.dma_semaphore, #tpu.memory_space<semaphore_mem>> -> memref<!tpu.dma_semaphore, #tpu.memory_space<semaphore_mem>>
      tpu.enqueue_dma source(%111 : memref<1x128xf32, #tpu.memory_space<any>>) target(%113 : memref<1x128xf32, #tpu.memory_space<vmem>>) target_semaphore(%115 : memref<!tpu.dma_semaphore, #tpu.memory_space<semaphore_mem>>)
      %c1_i32_57 = arith.constant 1 : i32
      %c0_i32_58 = arith.constant 0 : i32
      %116 = tpu.memref_slice %arg6[%110, %c0_i32_58] : memref<64x128xf32, #tpu.memory_space<any>> -> memref<1x128xf32, #tpu.memory_space<any>>
      %c0_i32_59 = arith.constant 0 : i32
      %117 = tpu.memref_slice %arg9[%71, %c2_i32_53, %c0_i32_59] : memref<2x8x128xf32, #tpu.memory_space<vmem>> -> memref<1x1x128xf32, #tpu.memory_space<vmem>>
      %118 = tpu.memref_squeeze %117 : memref<1x1x128xf32, #tpu.memory_space<vmem>> -> memref<1x128xf32, #tpu.memory_space<vmem>>
      %119 = tpu.memref_slice %arg10[%c1_i32_57, %71] : memref<2x2x!tpu.dma_semaphore, #tpu.memory_space<semaphore_mem>> -> memref<1x1x!tpu.dma_semaphore, #tpu.memory_space<semaphore_mem>>
      %120 = tpu.memref_squeeze %119 : memref<1x1x!tpu.dma_semaphore, #tpu.memory_space<semaphore_mem>> -> memref<!tpu.dma_semaphore, #tpu.memory_space<semaphore_mem>>
      tpu.enqueue_dma source(%116 : memref<1x128xf32, #tpu.memory_space<any>>) target(%118 : memref<1x128xf32, #tpu.memory_space<vmem>>) target_semaphore(%120 : memref<!tpu.dma_semaphore, #tpu.memory_space<semaphore_mem>>)
      %c3_i32 = arith.constant 3 : i32
      %121 = arith.addi %72, %c3_i32 : i32
      %122 = arith.index_cast %121 : i32 to index
      %123 = memref.load %arg2[%122] : memref<8xi32, #tpu.memory_space<smem>>
      %124 = arith.addi %72, %c3_i32 : i32
      %125 = arith.index_cast %124 : i32 to index
      %126 = memref.load %arg3[%125] : memref<8xi32, #tpu.memory_space<smem>>
      %c0_i32_60 = arith.constant 0 : i32
      %c0_i32_61 = arith.constant 0 : i32
      %127 = tpu.memref_slice %arg6[%123, %c0_i32_61] : memref<64x128xf32, #tpu.memory_space<any>> -> memref<1x128xf32, #tpu.memory_space<any>>
      %c0_i32_62 = arith.constant 0 : i32
      %128 = tpu.memref_slice %arg8[%71, %c3_i32, %c0_i32_62] : memref<2x8x128xf32, #tpu.memory_space<vmem>> -> memref<1x1x128xf32, #tpu.memory_space<vmem>>
      %129 = tpu.memref_squeeze %128 : memref<1x1x128xf32, #tpu.memory_space<vmem>> -> memref<1x128xf32, #tpu.memory_space<vmem>>
      %130 = tpu.memref_slice %arg10[%c0_i32_60, %71] : memref<2x2x!tpu.dma_semaphore, #tpu.memory_space<semaphore_mem>> -> memref<1x1x!tpu.dma_semaphore, #tpu.memory_space<semaphore_mem>>
      %131 = tpu.memref_squeeze %130 : memref<1x1x!tpu.dma_semaphore, #tpu.memory_space<semaphore_mem>> -> memref<!tpu.dma_semaphore, #tpu.memory_space<semaphore_mem>>
      tpu.enqueue_dma source(%127 : memref<1x128xf32, #tpu.memory_space<any>>) target(%129 : memref<1x128xf32, #tpu.memory_space<vmem>>) target_semaphore(%131 : memref<!tpu.dma_semaphore, #tpu.memory_space<semaphore_mem>>)
      %c1_i32_63 = arith.constant 1 : i32
      %c0_i32_64 = arith.constant 0 : i32
      %132 = tpu.memref_slice %arg6[%126, %c0_i32_64] : memref<64x128xf32, #tpu.memory_space<any>> -> memref<1x128xf32, #tpu.memory_space<any>>
      %c0_i32_65 = arith.constant 0 : i32
      %133 = tpu.memref_slice %arg9[%71, %c3_i32, %c0_i32_65] : memref<2x8x128xf32, #tpu.memory_space<vmem>> -> memref<1x1x128xf32, #tpu.memory_space<vmem>>
      %134 = tpu.memref_squeeze %133 : memref<1x1x128xf32, #tpu.memory_space<vmem>> -> memref<1x128xf32, #tpu.memory_space<vmem>>
      %135 = tpu.memref_slice %arg10[%c1_i32_63, %71] : memref<2x2x!tpu.dma_semaphore, #tpu.memory_space<semaphore_mem>> -> memref<1x1x!tpu.dma_semaphore, #tpu.memory_space<semaphore_mem>>
      %136 = tpu.memref_squeeze %135 : memref<1x1x!tpu.dma_semaphore, #tpu.memory_space<semaphore_mem>> -> memref<!tpu.dma_semaphore, #tpu.memory_space<semaphore_mem>>
      tpu.enqueue_dma source(%132 : memref<1x128xf32, #tpu.memory_space<any>>) target(%134 : memref<1x128xf32, #tpu.memory_space<vmem>>) target_semaphore(%136 : memref<!tpu.dma_semaphore, #tpu.memory_space<semaphore_mem>>)
      %c4_i32 = arith.constant 4 : i32
      %137 = arith.addi %72, %c4_i32 : i32
      %138 = arith.index_cast %137 : i32 to index
      %139 = memref.load %arg2[%138] : memref<8xi32, #tpu.memory_space<smem>>
      %140 = arith.addi %72, %c4_i32 : i32
      %141 = arith.index_cast %140 : i32 to index
      %142 = memref.load %arg3[%141] : memref<8xi32, #tpu.memory_space<smem>>
      %c0_i32_66 = arith.constant 0 : i32
      %c0_i32_67 = arith.constant 0 : i32
      %143 = tpu.memref_slice %arg6[%139, %c0_i32_67] : memref<64x128xf32, #tpu.memory_space<any>> -> memref<1x128xf32, #tpu.memory_space<any>>
      %c0_i32_68 = arith.constant 0 : i32
      %144 = tpu.memref_slice %arg8[%71, %c4_i32, %c0_i32_68] : memref<2x8x128xf32, #tpu.memory_space<vmem>> -> memref<1x1x128xf32, #tpu.memory_space<vmem>>
      %145 = tpu.memref_squeeze %144 : memref<1x1x128xf32, #tpu.memory_space<vmem>> -> memref<1x128xf32, #tpu.memory_space<vmem>>
      %146 = tpu.memref_slice %arg10[%c0_i32_66, %71] : memref<2x2x!tpu.dma_semaphore, #tpu.memory_space<semaphore_mem>> -> memref<1x1x!tpu.dma_semaphore, #tpu.memory_space<semaphore_mem>>
      %147 = tpu.memref_squeeze %146 : memref<1x1x!tpu.dma_semaphore, #tpu.memory_space<semaphore_mem>> -> memref<!tpu.dma_semaphore, #tpu.memory_space<semaphore_mem>>
      tpu.enqueue_dma source(%143 : memref<1x128xf32, #tpu.memory_space<any>>) target(%145 : memref<1x128xf32, #tpu.memory_space<vmem>>) target_semaphore(%147 : memref<!tpu.dma_semaphore, #tpu.memory_space<semaphore_mem>>)
      %c1_i32_69 = arith.constant 1 : i32
      %c0_i32_70 = arith.constant 0 : i32
      %148 = tpu.memref_slice %arg6[%142, %c0_i32_70] : memref<64x128xf32, #tpu.memory_space<any>> -> memref<1x128xf32, #tpu.memory_space<any>>
      %c0_i32_71 = arith.constant 0 : i32
      %149 = tpu.memref_slice %arg9[%71, %c4_i32, %c0_i32_71] : memref<2x8x128xf32, #tpu.memory_space<vmem>> -> memref<1x1x128xf32, #tpu.memory_space<vmem>>
      %150 = tpu.memref_squeeze %149 : memref<1x1x128xf32, #tpu.memory_space<vmem>> -> memref<1x128xf32, #tpu.memory_space<vmem>>
      %151 = tpu.memref_slice %arg10[%c1_i32_69, %71] : memref<2x2x!tpu.dma_semaphore, #tpu.memory_space<semaphore_mem>> -> memref<1x1x!tpu.dma_semaphore, #tpu.memory_space<semaphore_mem>>
      %152 = tpu.memref_squeeze %151 : memref<1x1x!tpu.dma_semaphore, #tpu.memory_space<semaphore_mem>> -> memref<!tpu.dma_semaphore, #tpu.memory_space<semaphore_mem>>
      tpu.enqueue_dma source(%148 : memref<1x128xf32, #tpu.memory_space<any>>) target(%150 : memref<1x128xf32, #tpu.memory_space<vmem>>) target_semaphore(%152 : memref<!tpu.dma_semaphore, #tpu.memory_space<semaphore_mem>>)
      %c5_i32 = arith.constant 5 : i32
      %153 = arith.addi %72, %c5_i32 : i32
      %154 = arith.index_cast %153 : i32 to index
      %155 = memref.load %arg2[%154] : memref<8xi32, #tpu.memory_space<smem>>
      %156 = arith.addi %72, %c5_i32 : i32
      %157 = arith.index_cast %156 : i32 to index
      %158 = memref.load %arg3[%157] : memref<8xi32, #tpu.memory_space<smem>>
      %c0_i32_72 = arith.constant 0 : i32
      %c0_i32_73 = arith.constant 0 : i32
      %159 = tpu.memref_slice %arg6[%155, %c0_i32_73] : memref<64x128xf32, #tpu.memory_space<any>> -> memref<1x128xf32, #tpu.memory_space<any>>
      %c0_i32_74 = arith.constant 0 : i32
      %160 = tpu.memref_slice %arg8[%71, %c5_i32, %c0_i32_74] : memref<2x8x128xf32, #tpu.memory_space<vmem>> -> memref<1x1x128xf32, #tpu.memory_space<vmem>>
      %161 = tpu.memref_squeeze %160 : memref<1x1x128xf32, #tpu.memory_space<vmem>> -> memref<1x128xf32, #tpu.memory_space<vmem>>
      %162 = tpu.memref_slice %arg10[%c0_i32_72, %71] : memref<2x2x!tpu.dma_semaphore, #tpu.memory_space<semaphore_mem>> -> memref<1x1x!tpu.dma_semaphore, #tpu.memory_space<semaphore_mem>>
      %163 = tpu.memref_squeeze %162 : memref<1x1x!tpu.dma_semaphore, #tpu.memory_space<semaphore_mem>> -> memref<!tpu.dma_semaphore, #tpu.memory_space<semaphore_mem>>
      tpu.enqueue_dma source(%159 : memref<1x128xf32, #tpu.memory_space<any>>) target(%161 : memref<1x128xf32, #tpu.memory_space<vmem>>) target_semaphore(%163 : memref<!tpu.dma_semaphore, #tpu.memory_space<semaphore_mem>>)
      %c1_i32_75 = arith.constant 1 : i32
      %c0_i32_76 = arith.constant 0 : i32
      %164 = tpu.memref_slice %arg6[%158, %c0_i32_76] : memref<64x128xf32, #tpu.memory_space<any>> -> memref<1x128xf32, #tpu.memory_space<any>>
      %c0_i32_77 = arith.constant 0 : i32
      %165 = tpu.memref_slice %arg9[%71, %c5_i32, %c0_i32_77] : memref<2x8x128xf32, #tpu.memory_space<vmem>> -> memref<1x1x128xf32, #tpu.memory_space<vmem>>
      %166 = tpu.memref_squeeze %165 : memref<1x1x128xf32, #tpu.memory_space<vmem>> -> memref<1x128xf32, #tpu.memory_space<vmem>>
      %167 = tpu.memref_slice %arg10[%c1_i32_75, %71] : memref<2x2x!tpu.dma_semaphore, #tpu.memory_space<semaphore_mem>> -> memref<1x1x!tpu.dma_semaphore, #tpu.memory_space<semaphore_mem>>
      %168 = tpu.memref_squeeze %167 : memref<1x1x!tpu.dma_semaphore, #tpu.memory_space<semaphore_mem>> -> memref<!tpu.dma_semaphore, #tpu.memory_space<semaphore_mem>>
      tpu.enqueue_dma source(%164 : memref<1x128xf32, #tpu.memory_space<any>>) target(%166 : memref<1x128xf32, #tpu.memory_space<vmem>>) target_semaphore(%168 : memref<!tpu.dma_semaphore, #tpu.memory_space<semaphore_mem>>)
      %c6_i32 = arith.constant 6 : i32
      %169 = arith.addi %72, %c6_i32 : i32
      %170 = arith.index_cast %169 : i32 to index
      %171 = memref.load %arg2[%170] : memref<8xi32, #tpu.memory_space<smem>>
      %172 = arith.addi %72, %c6_i32 : i32
      %173 = arith.index_cast %172 : i32 to index
      %174 = memref.load %arg3[%173] : memref<8xi32, #tpu.memory_space<smem>>
      %c0_i32_78 = arith.constant 0 : i32
      %c0_i32_79 = arith.constant 0 : i32
      %175 = tpu.memref_slice %arg6[%171, %c0_i32_79] : memref<64x128xf32, #tpu.memory_space<any>> -> memref<1x128xf32, #tpu.memory_space<any>>
      %c0_i32_80 = arith.constant 0 : i32
      %176 = tpu.memref_slice %arg8[%71, %c6_i32, %c0_i32_80] : memref<2x8x128xf32, #tpu.memory_space<vmem>> -> memref<1x1x128xf32, #tpu.memory_space<vmem>>
      %177 = tpu.memref_squeeze %176 : memref<1x1x128xf32, #tpu.memory_space<vmem>> -> memref<1x128xf32, #tpu.memory_space<vmem>>
      %178 = tpu.memref_slice %arg10[%c0_i32_78, %71] : memref<2x2x!tpu.dma_semaphore, #tpu.memory_space<semaphore_mem>> -> memref<1x1x!tpu.dma_semaphore, #tpu.memory_space<semaphore_mem>>
      %179 = tpu.memref_squeeze %178 : memref<1x1x!tpu.dma_semaphore, #tpu.memory_space<semaphore_mem>> -> memref<!tpu.dma_semaphore, #tpu.memory_space<semaphore_mem>>
      tpu.enqueue_dma source(%175 : memref<1x128xf32, #tpu.memory_space<any>>) target(%177 : memref<1x128xf32, #tpu.memory_space<vmem>>) target_semaphore(%179 : memref<!tpu.dma_semaphore, #tpu.memory_space<semaphore_mem>>)
      %c1_i32_81 = arith.constant 1 : i32
      %c0_i32_82 = arith.constant 0 : i32
      %180 = tpu.memref_slice %arg6[%174, %c0_i32_82] : memref<64x128xf32, #tpu.memory_space<any>> -> memref<1x128xf32, #tpu.memory_space<any>>
      %c0_i32_83 = arith.constant 0 : i32
      %181 = tpu.memref_slice %arg9[%71, %c6_i32, %c0_i32_83] : memref<2x8x128xf32, #tpu.memory_space<vmem>> -> memref<1x1x128xf32, #tpu.memory_space<vmem>>
      %182 = tpu.memref_squeeze %181 : memref<1x1x128xf32, #tpu.memory_space<vmem>> -> memref<1x128xf32, #tpu.memory_space<vmem>>
      %183 = tpu.memref_slice %arg10[%c1_i32_81, %71] : memref<2x2x!tpu.dma_semaphore, #tpu.memory_space<semaphore_mem>> -> memref<1x1x!tpu.dma_semaphore, #tpu.memory_space<semaphore_mem>>
      %184 = tpu.memref_squeeze %183 : memref<1x1x!tpu.dma_semaphore, #tpu.memory_space<semaphore_mem>> -> memref<!tpu.dma_semaphore, #tpu.memory_space<semaphore_mem>>
      tpu.enqueue_dma source(%180 : memref<1x128xf32, #tpu.memory_space<any>>) target(%182 : memref<1x128xf32, #tpu.memory_space<vmem>>) target_semaphore(%184 : memref<!tpu.dma_semaphore, #tpu.memory_space<semaphore_mem>>)
      %c7_i32 = arith.constant 7 : i32
      %185 = arith.addi %72, %c7_i32 : i32
      %186 = arith.index_cast %185 : i32 to index
      %187 = memref.load %arg2[%186] : memref<8xi32, #tpu.memory_space<smem>>
      %188 = arith.addi %72, %c7_i32 : i32
      %189 = arith.index_cast %188 : i32 to index
      %190 = memref.load %arg3[%189] : memref<8xi32, #tpu.memory_space<smem>>
      %c0_i32_84 = arith.constant 0 : i32
      %c0_i32_85 = arith.constant 0 : i32
      %191 = tpu.memref_slice %arg6[%187, %c0_i32_85] : memref<64x128xf32, #tpu.memory_space<any>> -> memref<1x128xf32, #tpu.memory_space<any>>
      %c0_i32_86 = arith.constant 0 : i32
      %192 = tpu.memref_slice %arg8[%71, %c7_i32, %c0_i32_86] : memref<2x8x128xf32, #tpu.memory_space<vmem>> -> memref<1x1x128xf32, #tpu.memory_space<vmem>>
      %193 = tpu.memref_squeeze %192 : memref<1x1x128xf32, #tpu.memory_space<vmem>> -> memref<1x128xf32, #tpu.memory_space<vmem>>
      %194 = tpu.memref_slice %arg10[%c0_i32_84, %71] : memref<2x2x!tpu.dma_semaphore, #tpu.memory_space<semaphore_mem>> -> memref<1x1x!tpu.dma_semaphore, #tpu.memory_space<semaphore_mem>>
      %195 = tpu.memref_squeeze %194 : memref<1x1x!tpu.dma_semaphore, #tpu.memory_space<semaphore_mem>> -> memref<!tpu.dma_semaphore, #tpu.memory_space<semaphore_mem>>
      tpu.enqueue_dma source(%191 : memref<1x128xf32, #tpu.memory_space<any>>) target(%193 : memref<1x128xf32, #tpu.memory_space<vmem>>) target_semaphore(%195 : memref<!tpu.dma_semaphore, #tpu.memory_space<semaphore_mem>>)
      %c1_i32_87 = arith.constant 1 : i32
      %c0_i32_88 = arith.constant 0 : i32
      %196 = tpu.memref_slice %arg6[%190, %c0_i32_88] : memref<64x128xf32, #tpu.memory_space<any>> -> memref<1x128xf32, #tpu.memory_space<any>>
      %c0_i32_89 = arith.constant 0 : i32
      %197 = tpu.memref_slice %arg9[%71, %c7_i32, %c0_i32_89] : memref<2x8x128xf32, #tpu.memory_space<vmem>> -> memref<1x1x128xf32, #tpu.memory_space<vmem>>
      %198 = tpu.memref_squeeze %197 : memref<1x1x128xf32, #tpu.memory_space<vmem>> -> memref<1x128xf32, #tpu.memory_space<vmem>>
      %199 = tpu.memref_slice %arg10[%c1_i32_87, %71] : memref<2x2x!tpu.dma_semaphore, #tpu.memory_space<semaphore_mem>> -> memref<1x1x!tpu.dma_semaphore, #tpu.memory_space<semaphore_mem>>
      %200 = tpu.memref_squeeze %199 : memref<1x1x!tpu.dma_semaphore, #tpu.memory_space<semaphore_mem>> -> memref<!tpu.dma_semaphore, #tpu.memory_space<semaphore_mem>>
      tpu.enqueue_dma source(%196 : memref<1x128xf32, #tpu.memory_space<any>>) target(%198 : memref<1x128xf32, #tpu.memory_space<vmem>>) target_semaphore(%200 : memref<!tpu.dma_semaphore, #tpu.memory_space<semaphore_mem>>)
      %c8_i32_90 = arith.constant 8 : i32
    } else {
    }
    %c2_i32 = arith.constant 2 : i32
    %c0_i32_3 = arith.constant 0 : i32
    %7 = arith.cmpi eq, %c2_i32, %c0_i32_3 : i32
    %c1_i32_4 = arith.constant 1 : i32
    %8 = arith.select %7, %c1_i32_4, %c2_i32 : i32
    %9 = arith.remsi %arg1, %8 : i32
    %c0_i32_5 = arith.constant 0 : i32
    %10 = arith.cmpi ne, %9, %c0_i32_5 : i32
    %c0_i32_6 = arith.constant 0 : i32
    %11 = arith.cmpi slt, %9, %c0_i32_6 : i32
    %c0_i32_7 = arith.constant 0 : i32
    %12 = arith.cmpi slt, %8, %c0_i32_7 : i32
    %13 = arith.xori %11, %12 : i1
    %14 = arith.andi %13, %10 : i1
    %15 = arith.addi %9, %8 : i32
    %16 = arith.select %14, %15, %9 : i32
    %c0_i32_8 = arith.constant 0 : i32
    %c0_i32_9 = arith.constant 0 : i32
    %c0_i32_10 = arith.constant 0 : i32
    %17 = tpu.memref_slice %arg8[%16, %c0_i32_9, %c0_i32_10] : memref<2x8x128xf32, #tpu.memory_space<vmem>> -> memref<1x8x128xf32, #tpu.memory_space<vmem>>
    %18 = tpu.memref_squeeze %17 : memref<1x8x128xf32, #tpu.memory_space<vmem>> -> memref<8x128xf32, #tpu.memory_space<vmem>>
    %c0_i32_11 = arith.constant 0 : i32
    %c0_i32_12 = arith.constant 0 : i32
    %19 = tpu.memref_slice %arg8[%16, %c0_i32_11, %c0_i32_12] : memref<2x8x128xf32, #tpu.memory_space<vmem>> -> memref<1x8x128xf32, #tpu.memory_space<vmem>>
    %20 = tpu.memref_squeeze %19 : memref<1x8x128xf32, #tpu.memory_space<vmem>> -> memref<8x128xf32, #tpu.memory_space<vmem>>
    %21 = tpu.memref_slice %arg10[%c0_i32_8, %16] : memref<2x2x!tpu.dma_semaphore, #tpu.memory_space<semaphore_mem>> -> memref<1x1x!tpu.dma_semaphore, #tpu.memory_space<semaphore_mem>>
    %22 = tpu.memref_squeeze %21 : memref<1x1x!tpu.dma_semaphore, #tpu.memory_space<semaphore_mem>> -> memref<!tpu.dma_semaphore, #tpu.memory_space<semaphore_mem>>
    tpu.wait_dma2 semaphore(%22 : memref<!tpu.dma_semaphore, #tpu.memory_space<semaphore_mem>>) src(%18 : memref<8x128xf32, #tpu.memory_space<vmem>>) dst(%20 : memref<8x128xf32, #tpu.memory_space<vmem>>)
    %c1_i32_13 = arith.constant 1 : i32
    %c0_i32_14 = arith.constant 0 : i32
    %c0_i32_15 = arith.constant 0 : i32
    %23 = tpu.memref_slice %arg9[%16, %c0_i32_14, %c0_i32_15] : memref<2x8x128xf32, #tpu.memory_space<vmem>> -> memref<1x8x128xf32, #tpu.memory_space<vmem>>
    %24 = tpu.memref_squeeze %23 : memref<1x8x128xf32, #tpu.memory_space<vmem>> -> memref<8x128xf32, #tpu.memory_space<vmem>>
    %c0_i32_16 = arith.constant 0 : i32
    %c0_i32_17 = arith.constant 0 : i32
    %25 = tpu.memref_slice %arg9[%16, %c0_i32_16, %c0_i32_17] : memref<2x8x128xf32, #tpu.memory_space<vmem>> -> memref<1x8x128xf32, #tpu.memory_space<vmem>>
    %26 = tpu.memref_squeeze %25 : memref<1x8x128xf32, #tpu.memory_space<vmem>> -> memref<8x128xf32, #tpu.memory_space<vmem>>
    %27 = tpu.memref_slice %arg10[%c1_i32_13, %16] : memref<2x2x!tpu.dma_semaphore, #tpu.memory_space<semaphore_mem>> -> memref<1x1x!tpu.dma_semaphore, #tpu.memory_space<semaphore_mem>>
    %28 = tpu.memref_squeeze %27 : memref<1x1x!tpu.dma_semaphore, #tpu.memory_space<semaphore_mem>> -> memref<!tpu.dma_semaphore, #tpu.memory_space<semaphore_mem>>
    tpu.wait_dma2 semaphore(%28 : memref<!tpu.dma_semaphore, #tpu.memory_space<semaphore_mem>>) src(%24 : memref<8x128xf32, #tpu.memory_space<vmem>>) dst(%26 : memref<8x128xf32, #tpu.memory_space<vmem>>)
    %29 = arith.index_cast %16 : i32 to index
    %c0 = arith.constant 0 : index
    %c0_18 = arith.constant 0 : index
    %30 = vector.load %arg8[%29, %c0, %c0_18] : memref<2x8x128xf32, #tpu.memory_space<vmem>>, vector<1x8x128xf32>
    %31 = vector.shape_cast %30 : vector<1x8x128xf32> to vector<8x128xf32>
    %32 = arith.index_cast %16 : i32 to index
    %c0_19 = arith.constant 0 : index
    %c0_20 = arith.constant 0 : index
    %33 = vector.load %arg9[%32, %c0_19, %c0_20] : memref<2x8x128xf32, #tpu.memory_space<vmem>>, vector<1x8x128xf32>
    %34 = vector.shape_cast %33 : vector<1x8x128xf32> to vector<8x128xf32>
    %c0_21 = arith.constant 0 : index
    %c0_22 = arith.constant 0 : index
    %35 = vector.load %arg4[%c0_21, %c0_22] : memref<8x1xi32, #tpu.memory_space<vmem>>, vector<8x1xi32>
    %36 = tpu.iota {dimensions = array<i32: 1>} : vector<8x16xi32>
    %37 = vector.broadcast %35 : vector<8x1xi32> to vector<8x16xi32>
    %38 = arith.cmpi eq, %37, %36 : vector<8x16xi32>
    %39 = arith.extui %38 : vector<8x16xi1> to vector<8x16xi32>
    %40 = arith.sitofp %39 : vector<8x16xi32> to vector<8x16xf32>
    %c0_23 = arith.constant 0 : index
    %c0_24 = arith.constant 0 : index
    %41 = vector.load %arg5[%c0_23, %c0_24] : memref<16x256xf32, #tpu.memory_space<vmem>>, vector<16x256xf32>
    %cst = arith.constant dense<0.000000e+00> : vector<8x256xf32>
    %42 = tpu.matmul %40, %41, %cst {dimension_numbers = #tpu.dot_dimension_numbers<[1], [0], [0], [1], [0, 0, 1, 1], [], []>} : vector<8x16xf32>, vector<16x256xf32>, vector<8x256xf32> -> vector<8x256xf32>
    %43 = vector.extract_strided_slice %42 {offsets = [0, 0], sizes = [8, 128], strides = [1, 1]} : vector<8x256xf32> to vector<8x128xf32>
    %44 = vector.extract_strided_slice %42 {offsets = [0, 128], sizes = [8, 128], strides = [1, 1]} : vector<8x256xf32> to vector<8x128xf32>
    %45 = arith.subf %31, %34 : vector<8x128xf32>
    %46 = arith.addf %45, %43 : vector<8x128xf32>
    %47 = arith.mulf %45, %44 : vector<8x128xf32>
    %cst_25 = arith.constant dense<0.000000e+00> : vector<8xf32>
    %48 = vector.multi_reduction <add>, %47, %cst_25 [1] : vector<8x128xf32> to vector<8xf32>
    %49 = vector.shape_cast %48 : vector<8xf32> to vector<8x1xf32>
    %50 = vector.broadcast %49 : vector<8x1xf32> to vector<8x128xf32>
    %51 = arith.mulf %50, %44 : vector<8x128xf32>
    %52 = arith.subf %46, %51 : vector<8x128xf32>
    %53 = math.absf %52 : vector<8x128xf32>
    %cst_26 = arith.constant dense<0.000000e+00> : vector<8xf32>
    %54 = vector.multi_reduction <add>, %53, %cst_26 [1] : vector<8x128xf32> to vector<8xf32>
    %c0_27 = arith.constant 0 : index
    %c0_28 = arith.constant 0 : index
    %c0_29 = arith.constant 0 : index
    %55 = vector.load %arg7[%c0_27, %c0_28, %c0_29] : memref<1x1x8xf32, #tpu.memory_space<vmem>>, vector<1x1x8xf32>
    %56 = vector.shape_cast %55 : vector<1x1x8xf32> to vector<8xf32>
    %57 = vector.shape_cast %54 : vector<8xf32> to vector<1x1x8xf32>
    tpu.vector_store %arg7[%c0_27, %c0_28, %c0_29], %57 {strides = array<i32>} : memref<1x1x8xf32, #tpu.memory_space<vmem>>, vector<1x1x8xf32>,
    return
  }
  func.func @transform_0(%arg0: i32, %arg1: i32, %arg2: memref<8xi32, #tpu.memory_space<smem>>, %arg3: memref<8xi32, #tpu.memory_space<smem>>) -> (i32, i32) {
    %c1_i32 = arith.constant 1 : i32
    %0 = arith.muli %arg0, %c1_i32 : i32
    %1 = arith.addi %0, %arg1 : i32
    %c0_i32 = arith.constant 0 : i32
    %c0_i32_0 = arith.constant 0 : i32
    return %1, %c0_i32 : i32, i32
  }
  func.func @transform_1(%arg0: i32, %arg1: i32, %arg2: memref<8xi32, #tpu.memory_space<smem>>, %arg3: memref<8xi32, #tpu.memory_space<smem>>) -> (i32, i32) {
    %c0_i32 = arith.constant 0 : i32
    %c0_i32_0 = arith.constant 0 : i32
    %c0_i32_1 = arith.constant 0 : i32
    return %c0_i32, %c0_i32_0 : i32, i32
  }
  func.func @transform_3(%arg0: i32, %arg1: i32, %arg2: memref<8xi32, #tpu.memory_space<smem>>, %arg3: memref<8xi32, #tpu.memory_space<smem>>) -> (i32, i32, i32) {
    %c1_i32 = arith.constant 1 : i32
    %0 = arith.muli %arg0, %c1_i32 : i32
    %1 = arith.addi %0, %arg1 : i32
    %c0_i32 = arith.constant 0 : i32
    %c0_i32_0 = arith.constant 0 : i32
    %c0_i32_1 = arith.constant 0 : i32
    return %1, %c0_i32, %c0_i32_0 : i32, i32, i32
  }
}

</mosaic_0001>

<bundles_post_ra>
// kernel: tpu_custom_call.1
= control target key start
LH: loop header
LB: loop body
LE: loop exit
PB: predicated region body
PF: predicated region fallthrough
CT: control target
= control target key end

     0   :  { %s1384_s24 = smov [#allocation6]   ;;  %s1385_s25 = smov [#allocation7]   ;;  %s1627_s0 = inlined_call_operand.vmem [shape: s32[8], index: 0, kind: input, shape index: {}]   ;;  %s1628_s2 = inlined_call_operand.vmem [shape: s32[8,1], index: 2, kind: input, shape index: {}]   ;;  %s1629_s3 = inlined_call_operand.hbm [shape: f32[16,256], index: 3, kind: input, shape index: {}]   ;;  %s1630_s4 = inlined_call_operand.hbm [shape: f32[64,128], index: 4, kind: input, shape index: {}]   ;;  %s1631_s5 = inlined_call_operand.hbm [shape: f32[1,1,8], index: 5, kind: output, shape index: {}]   ;;  %s1632_s1 = inlined_call_operand.vmem [shape: s32[8], index: 1, kind: input, shape index: {}]  }
   0x1   :  { %s11_s20 = sshll.u32 %s1627_s0, 4  ;;  %s16_s23 = sshll.u32 %s1632_s1, 4  ;;  %s12_s20 = int_to_ptr.vmem [resolvable:$true] %s11_s20  ;;  %s17_s23 = int_to_ptr.vmem [resolvable:$true] %s16_s23 }
   0x2   :  { %14 = dma.vmem_to_smem %s12_s20, 16, %s1384_s24, [#allocation5] }
   0x3   :  { %19 = dma.vmem_to_smem %s17_s23, 16, %s1385_s25, [#allocation5] }
   0x4   :  { %1374 = dma.done.wait [#allocation5], 32 }
   0x5   :  { %1375 = vsyncadd [#allocation5], 4294967264 }
   0x6   :  { %22 = sfence }
   0x7   :  { %23 = vsyncpa [#allocation9], 0 }
   0x8   :  { %24 = vsyncpa [#allocation10], 0  ;;  %s37_s28 = sshll.u32 %s1629_s3, 4  ;;  %s1386_s0 = smov [#allocation8]   ;;  %s38_s28 = int_to_ptr.hbm [resolvable:$true] %s37_s28 }
   0x9   :  { %s39_s29 = sshll.u32 %s1386_s0, 4  ;;  %s1387_s1 = smov 256   ;;  %s40_s29 = int_to_ptr.vmem [resolvable:$true] %s39_s29 }
   0xa   :  { %s1388_s30 = smov 16  }
   0xb   :  { %45 = dma.hbm_to_vmem [thread:$0]  %s38_s28, 512, %s40_s29, [#allocation9], %s1387_s1, %s1387_s1, %s1388_s30  }
   0xc   :  { %1376 = dma.done.wait [#allocation9], 512  }
   0xd   :  { %1377 = vsyncadd [#allocation9], 4294966784  ;;  %s67_s6 = sld [smem:[#allocation6]]  ;;  %s1389_s7 = smov [#allocation2]  }
   0xe   :  { %s1447_s8 = sshll.u32 %s1389_s7, 4  ;;  %s68_s9 = sld [smem:[#allocation7]]  ;;  %s80_s8 = int_to_ptr.vmem [resolvable:$true] %s1447_s8 }
   0xf   :  { %s1390_s10 = smov [#allocation3]   ;;  %s1452_s3 = sld [smem:[#allocation6 + $0x1]] }
  0x10   :  { %s1450_s11 = sshll.u32 %s1390_s10, 4  ;;  %s1391_s12 = smov [#allocation2 + $0x1]   ;;  %s95_s11 = int_to_ptr.vmem [resolvable:$true] %s1450_s11 }
  0x11   :  { %s1455_s13 = sshll.u32 %s1391_s12, 4  ;;  %s1457_s14 = sld [smem:[#allocation7 + $0x1]]  ;;  %s113_s13 = int_to_ptr.vmem [resolvable:$true] %s1455_s13 }
  0x12   :  { %s1392_s18 = smov [#allocation3 + $0x1]   ;;  %s1471_s0 = scalar_lea.hbm %s1630_s4, 64 }
  0x13   :  { %s69_s17 = scalar_lea.hbm %s1630_s4, %s67_s6  ;;  %s1463_s19 = sshll.u32 %s1392_s18, 4  ;;  %s128_s19 = int_to_ptr.vmem [resolvable:$true] %s1463_s19 }
  0x14   :  { %s77_s20 = sshll.u32 %s69_s17, 4  ;;  %s83_s23 = scalar_lea.hbm %s1630_s4, %s68_s9  ;;  %s78_s20 = int_to_ptr.hbm [resolvable:$true] %s77_s20 }
  0x15   :  { %s92_s24 = sshll.u32 %s83_s23, 4  ;;  %s966_s25 = sshra.s32 %s78_s20, 4  ;;  %s967_s25 = int_to_ptr.hbm [resolvable:$true] %s966_s25  ;;  %s93_s24 = int_to_ptr.hbm [resolvable:$true] %s92_s24 }
  0x16   :  { %s968_s26 = scalar_lea.hbm %s967_s25, 1  ;;  %p971_p1 = scmp.lt.s32.totalorder %s967_s25, %s1630_s4 }
  0x17   :  { %p969_p0 = scmp.ne.s32.totalorder %s967_s25, %s968_s26  ;;  %p972_p2 = scmp.lt.s32.totalorder %s1471_s0, %s968_s26 }
  0x19   :  { %p973_p3 = por %p972_p2, %p971_p1 }
  0x1b   :  { %p974_p4 = pnand %p973_p3, %p969_p0 }
  0x1d   :  { %977 = shalt.err (!%p974_p4)  }
  0x1e   :  { %82 = dma.hbm_to_vmem [thread:$0]  %s78_s20, 16, %s80_s8, [#allocation4] }
  0x1f   :  { %s101_s7 = scalar_lea.hbm %s1630_s4, %s1452_s3  ;;  %s990_s9 = sshra.s32 %s93_s24, 4  ;;  %s991_s9 = int_to_ptr.hbm [resolvable:$true] %s990_s9 }
  0x20   :  { %s992_s10 = scalar_lea.hbm %s991_s9, 1  ;;  %p995_p6 = scmp.lt.s32.totalorder %s991_s9, %s1630_s4 }
  0x21   :  { %p993_p5 = scmp.ne.s32.totalorder %s991_s9, %s992_s10  ;;  %p996_p7 = scmp.lt.s32.totalorder %s1471_s0, %s992_s10 }
  0x23   :  { %p997_p8 = por %p996_p7, %p995_p6 }
  0x25   :  { %p998_p9 = pnand %p997_p8, %p993_p5 }
  0x27   :  { %1001 = shalt.err (!%p998_p9)  }
  0x28   :  { %97 = dma.hbm_to_vmem [thread:$0]  %s93_s24, 16, %s95_s11, [#allocation4 + $0x2] }
  0x29   :  { %s110_s8 = sshll.u32 %s101_s7, 4  ;;  %s116_s17 = scalar_lea.hbm %s1630_s4, %s1457_s14  ;;  %s111_s8 = int_to_ptr.hbm [resolvable:$true] %s110_s8 }
  0x2a   :  { %s125_s18 = sshll.u32 %s116_s17, 4  ;;  %s1014_s20 = sshra.s32 %s111_s8, 4  ;;  %s1015_s20 = int_to_ptr.hbm [resolvable:$true] %s1014_s20  ;;  %s126_s18 = int_to_ptr.hbm [resolvable:$true] %s125_s18 }
  0x2b   :  { %s1016_s21 = scalar_lea.hbm %s1015_s20, 1  ;;  %p1019_p11 = scmp.lt.s32.totalorder %s1015_s20, %s1630_s4 }
  0x2c   :  { %p1017_p10 = scmp.ne.s32.totalorder %s1015_s20, %s1016_s21  ;;  %p1020_p12 = scmp.lt.s32.totalorder %s1471_s0, %s1016_s21 }
  0x2e   :  { %p1021_p13 = por %p1020_p12, %p1019_p11 }
  0x30   :  { %p1022_p0 = pnand %p1021_p13, %p1017_p10 }
  0x32   :  { %1025 = shalt.err (!%p1022_p0)  }
  0x33   :  { %115 = dma.hbm_to_vmem [thread:$0]  %s111_s8, 16, %s113_s13, [#allocation4] }
  0x34   :  { %s1038_s11 = sshra.s32 %s126_s18, 4  ;;  %s1039_s11 = int_to_ptr.hbm [resolvable:$true] %s1038_s11 }
  0x35   :  { %s1040_s14 = scalar_lea.hbm %s1039_s11, 1  ;;  %p1043_p2 = scmp.lt.s32.totalorder %s1039_s11, %s1630_s4 }
  0x36   :  { %p1041_p1 = scmp.ne.s32.totalorder %s1039_s11, %s1040_s14  ;;  %p1044_p3 = scmp.lt.s32.totalorder %s1471_s0, %s1040_s14 }
  0x38   :  { %p1045_p4 = por %p1044_p3, %p1043_p2 }
  0x3a   :  { %p1046_p5 = pnand %p1045_p4, %p1041_p1 }
  0x3c   :  { %1049 = shalt.err (!%p1046_p5)  }
  0x3d   :  { %130 = dma.hbm_to_vmem [thread:$0]  %s126_s18, 16, %s128_s19, [#allocation4 + $0x2] }
  0x3e   :  { %s858_s26 = sld [smem:[#allocation6 + $0x2]]  ;;  %s1393_s27 = smov [#allocation2 + $0x2]  }
  0x3f   :  { %s145_s28 = sshll.u32 %s1393_s27, 4  ;;  %s859_s29 = sld [smem:[#allocation7 + $0x2]]  ;;  %s146_s28 = int_to_ptr.vmem [resolvable:$true] %s145_s28 }
  0x40   :  { %s1394_s13 = smov [#allocation3 + $0x2]   ;;  %s1504_s30 = sld [smem:[#allocation6 + $0x3]] }
  0x41   :  { %s1502_s1 = sshll.u32 %s1394_s13, 4  ;;  %s1395_s6 = smov [#allocation2 + $0x3]   ;;  %s161_s1 = int_to_ptr.vmem [resolvable:$true] %s1502_s1 }
  0x42   :  { %s1507_s7 = sshll.u32 %s1395_s6, 4  ;;  %s1509_s9 = sld [smem:[#allocation7 + $0x3]]  ;;  %s179_s7 = int_to_ptr.vmem [resolvable:$true] %s1507_s7 }
  0x44   :  { %s134_s12 = scalar_lea.hbm %s1630_s4, %s858_s26 }
  0x45   :  { %s143_s15 = sshll.u32 %s134_s12, 4  ;;  %s149_s3 = scalar_lea.hbm %s1630_s4, %s859_s29  ;;  %s144_s15 = int_to_ptr.hbm [resolvable:$true] %s143_s15 }
  0x46   :  { %s158_s17 = sshll.u32 %s149_s3, 4  ;;  %s1062_s18 = sshra.s32 %s144_s15, 4  ;;  %s1063_s18 = int_to_ptr.hbm [resolvable:$true] %s1062_s18  ;;  %s159_s17 = int_to_ptr.hbm [resolvable:$true] %s158_s17 }
  0x47   :  { %s1064_s20 = scalar_lea.hbm %s1063_s18, 1  ;;  %p1067_p7 = scmp.lt.s32.totalorder %s1063_s18, %s1630_s4 }
  0x48   :  { %p1065_p6 = scmp.ne.s32.totalorder %s1063_s18, %s1064_s20  ;;  %p1068_p8 = scmp.lt.s32.totalorder %s1471_s0, %s1064_s20 }
  0x4a   :  { %p1069_p9 = por %p1068_p8, %p1067_p7 }
  0x4c   :  { %p1070_p10 = pnand %p1069_p9, %p1065_p6 }
  0x4e   :  { %1073 = shalt.err (!%p1070_p10)  }
  0x4f   :  { %148 = dma.hbm_to_vmem [thread:$0]  %s144_s15, 16, %s146_s28, [#allocation4] }
  0x50   :  { %s167_s14 = scalar_lea.hbm %s1630_s4, %s1504_s30  ;;  %s1086_s24 = sshra.s32 %s159_s17, 4  ;;  %s1087_s24 = int_to_ptr.hbm [resolvable:$true] %s1086_s24 }
  0x51   :  { %s1088_s25 = scalar_lea.hbm %s1087_s24, 1  ;;  %p1091_p12 = scmp.lt.s32.totalorder %s1087_s24, %s1630_s4 }
  0x52   :  { %p1089_p11 = scmp.ne.s32.totalorder %s1087_s24, %s1088_s25  ;;  %p1092_p13 = scmp.lt.s32.totalorder %s1471_s0, %s1088_s25 }
  0x54   :  { %p1093_p0 = por %p1092_p13, %p1091_p12 }
  0x56   :  { %p1094_p1 = pnand %p1093_p0, %p1089_p11 }
  0x58   :  { %1097 = shalt.err (!%p1094_p1)  }
  0x59   :  { %163 = dma.hbm_to_vmem [thread:$0]  %s159_s17, 16, %s161_s1, [#allocation4 + $0x2] }
  0x5a   :  { %s176_s28 = sshll.u32 %s167_s14, 4  ;;  %s182_s30 = scalar_lea.hbm %s1630_s4, %s1509_s9  ;;  %s177_s28 = int_to_ptr.hbm [resolvable:$true] %s176_s28 }
  0x5b   :  { %s191_s6 = sshll.u32 %s182_s30, 4  ;;  %s1110_s19 = sshra.s32 %s177_s28, 4  ;;  %s1111_s19 = int_to_ptr.hbm [resolvable:$true] %s1110_s19  ;;  %s192_s6 = int_to_ptr.hbm [resolvable:$true] %s191_s6 }
  0x5c   :  { %s1112_s10 = scalar_lea.hbm %s1111_s19, 1  ;;  %p1115_p3 = scmp.lt.s32.totalorder %s1111_s19, %s1630_s4 }
  0x5d   :  { %p1113_p2 = scmp.ne.s32.totalorder %s1111_s19, %s1112_s10  ;;  %p1116_p4 = scmp.lt.s32.totalorder %s1471_s0, %s1112_s10 }
  0x5f   :  { %p1117_p5 = por %p1116_p4, %p1115_p3 }
  0x61   :  { %p1118_p6 = pnand %p1117_p5, %p1113_p2 }
  0x63   :  { %1121 = shalt.err (!%p1118_p6)  }
  0x64   :  { %181 = dma.hbm_to_vmem [thread:$0]  %s177_s28, 16, %s179_s7, [#allocation4] }
  0x65   :  { %s1396_s1 = smov [#allocation3 + $0x3]   ;;  %s862_s8 = sld [smem:[#allocation6 + $0x4]] }
  0x66   :  { %s193_s9 = sshll.u32 %s1396_s1, 4  ;;  %s1134_s16 = sshra.s32 %s192_s6, 4  ;;  %s194_s9 = int_to_ptr.vmem [resolvable:$true] %s193_s9  ;;  %s1135_s16 = int_to_ptr.hbm [resolvable:$true] %s1134_s16 }
  0x67   :  { %s1136_s3 = scalar_lea.hbm %s1135_s16, 1  ;;  %p1139_p8 = scmp.lt.s32.totalorder %s1135_s16, %s1630_s4 }
  0x68   :  { %p1137_p7 = scmp.ne.s32.totalorder %s1135_s16, %s1136_s3  ;;  %p1140_p9 = scmp.lt.s32.totalorder %s1471_s0, %s1136_s3 }
  0x6a   :  { %p1141_p10 = por %p1140_p9, %p1139_p8 }
  0x6c   :  { %p1142_p11 = pnand %p1141_p10, %p1137_p7 }
  0x6e   :  { %1145 = shalt.err (!%p1142_p11)  }
  0x6f   :  { %196 = dma.hbm_to_vmem [thread:$0]  %s192_s6, 16, %s194_s9, [#allocation4 + $0x2] }
  0x70   :  { %s1397_s20 = smov [#allocation2 + $0x4]   ;;  %s863_s21 = sld [smem:[#allocation7 + $0x4]] }
  0x71   :  { %s211_s7 = sshll.u32 %s1397_s20, 4  ;;  %s1398_s22 = smov [#allocation3 + $0x4]   ;;  %s212_s7 = int_to_ptr.vmem [resolvable:$true] %s211_s7 }
  0x72   :  { %s1546_s23 = sshll.u32 %s1398_s22, 4  ;;  %s864_s11 = sld [smem:[#allocation6 + $0x5]]  ;;  %s227_s23 = int_to_ptr.vmem [resolvable:$true] %s1546_s23 }
  0x73   :  { %s200_s25 = scalar_lea.hbm %s1630_s4, %s862_s8  ;;  %s1399_s27 = smov [#allocation2 + $0x5]  }
  0x74   :  { %s209_s26 = sshll.u32 %s200_s25, 4  ;;  %s1552_s28 = sshll.u32 %s1399_s27, 4  ;;  %s210_s26 = int_to_ptr.hbm [resolvable:$true] %s209_s26  ;;  %s245_s28 = int_to_ptr.vmem [resolvable:$true] %s1552_s28 }
  0x75   :  { %s1158_s29 = sshra.s32 %s210_s26, 4  ;;  %s1159_s29 = int_to_ptr.hbm [resolvable:$true] %s1158_s29 }
  0x76   :  { %s1160_s13 = scalar_lea.hbm %s1159_s29, 1  ;;  %p1163_p13 = scmp.lt.s32.totalorder %s1159_s29, %s1630_s4 }
  0x77   :  { %p1161_p12 = scmp.ne.s32.totalorder %s1159_s29, %s1160_s13  ;;  %p1164_p0 = scmp.lt.s32.totalorder %s1471_s0, %s1160_s13 }
  0x79   :  { %p1165_p1 = por %p1164_p0, %p1163_p13 }
  0x7b   :  { %p1166_p2 = pnand %p1165_p1, %p1161_p12 }
  0x7d   :  { %1169 = shalt.err (!%p1166_p2)  }
  0x7e   :  { %214 = dma.hbm_to_vmem [thread:$0]  %s210_s26, 16, %s212_s7, [#allocation4] }
  0x7f   :  { %s215_s12 = scalar_lea.hbm %s1630_s4, %s863_s21  ;;  %s233_s8 = scalar_lea.hbm %s1630_s4, %s864_s11 }
  0x80   :  { %s224_s15 = sshll.u32 %s215_s12, 4  ;;  %s242_s16 = sshll.u32 %s233_s8, 4  ;;  %s225_s15 = int_to_ptr.hbm [resolvable:$true] %s224_s15  ;;  %s243_s16 = int_to_ptr.hbm [resolvable:$true] %s242_s16 }
  0x81   :  { %s1182_s3 = sshra.s32 %s225_s15, 4  ;;  %s1183_s3 = int_to_ptr.hbm [resolvable:$true] %s1182_s3 }
  0x82   :  { %s1184_s17 = scalar_lea.hbm %s1183_s3, 1  ;;  %p1187_p4 = scmp.lt.s32.totalorder %s1183_s3, %s1630_s4 }
  0x83   :  { %p1185_p3 = scmp.ne.s32.totalorder %s1183_s3, %s1184_s17  ;;  %p1188_p5 = scmp.lt.s32.totalorder %s1471_s0, %s1184_s17 }
  0x85   :  { %p1189_p6 = por %p1188_p5, %p1187_p4 }
  0x87   :  { %p1190_p7 = pnand %p1189_p6, %p1185_p3 }
  0x89   :  { %1193 = shalt.err (!%p1190_p7)  }
  0x8a   :  { %229 = dma.hbm_to_vmem [thread:$0]  %s225_s15, 16, %s227_s23, [#allocation4 + $0x2] }
  0x8b   :  { %s865_s7 = sld [smem:[#allocation7 + $0x5]]  ;;  %s1206_s21 = sshra.s32 %s243_s16, 4  ;;  %s1207_s21 = int_to_ptr.hbm [resolvable:$true] %s1206_s21 }
  0x8c   :  { %s1208_s22 = scalar_lea.hbm %s1207_s21, 1  ;;  %p1211_p9 = scmp.lt.s32.totalorder %s1207_s21, %s1630_s4 }
  0x8d   :  { %p1209_p8 = scmp.ne.s32.totalorder %s1207_s21, %s1208_s22  ;;  %p1212_p10 = scmp.lt.s32.totalorder %s1471_s0, %s1208_s22 }
  0x8f   :  { %p1213_p11 = por %p1212_p10, %p1211_p9 }
  0x91   :  { %p1214_p12 = pnand %p1213_p11, %p1209_p8 }
  0x93   :  { %1217 = shalt.err (!%p1214_p12)  }
  0x94   :  { %247 = dma.hbm_to_vmem [thread:$0]  %s243_s16, 16, %s245_s28, [#allocation4] }
  0x95   :  { %s866_s24 = sld [smem:[#allocation6 + $0x6]]  ;;  %s1400_s25 = smov [#allocation3 + $0x5]  }
  0x96   :  { %s259_s26 = sshll.u32 %s1400_s25, 4  ;;  %s1401_s23 = smov [#allocation2 + $0x6]   ;;  %s260_s26 = int_to_ptr.vmem [resolvable:$true] %s259_s26 }
  0x97   :  { %s1575_s27 = sshll.u32 %s1401_s23, 4  ;;  %s1578_s29 = sld [smem:[#allocation7 + $0x6]]  ;;  %s278_s27 = int_to_ptr.vmem [resolvable:$true] %s1575_s27 }
  0x98   :  { %s248_s6 = scalar_lea.hbm %s1630_s4, %s865_s7  ;;  %s1402_s10 = smov [#allocation3 + $0x6]  }
  0x99   :  { %s257_s19 = sshll.u32 %s248_s6, 4  ;;  %s1583_s12 = sshll.u32 %s1402_s10, 4  ;;  %s258_s19 = int_to_ptr.hbm [resolvable:$true] %s257_s19  ;;  %s293_s12 = int_to_ptr.vmem [resolvable:$true] %s1583_s12 }
  0x9a   :  { %s1230_s9 = sshra.s32 %s258_s19, 4  ;;  %s1231_s9 = int_to_ptr.hbm [resolvable:$true] %s1230_s9 }
  0x9b   :  { %s266_s1 = scalar_lea.hbm %s1630_s4, %s866_s24  ;;  %s1232_s8 = scalar_lea.hbm %s1231_s9, 1 }
  0x9c   :  { %p1233_p13 = scmp.ne.s32.totalorder %s1231_s9, %s1232_s8  ;;  %p1235_p0 = scmp.lt.s32.totalorder %s1231_s9, %s1630_s4 }
  0x9d   :  { %p1236_p1 = scmp.lt.s32.totalorder %s1471_s0, %s1232_s8 }
  0x9f   :  { %p1237_p2 = por %p1236_p1, %p1235_p0 }
  0xa1   :  { %p1238_p3 = pnand %p1237_p2, %p1233_p13 }
  0xa3   :  { %1241 = shalt.err (!%p1238_p3)  }
  0xa4   :  { %262 = dma.hbm_to_vmem [thread:$0]  %s258_s19, 16, %s260_s26, [#allocation4 + $0x2] }
  0xa5   :  { %s275_s17 = sshll.u32 %s266_s1, 4  ;;  %s281_s7 = scalar_lea.hbm %s1630_s4, %s1578_s29  ;;  %s276_s17 = int_to_ptr.hbm [resolvable:$true] %s275_s17 }
  0xa6   :  { %s1254_s21 = sshra.s32 %s276_s17, 4  ;;  %s1255_s21 = int_to_ptr.hbm [resolvable:$true] %s1254_s21 }
  0xa7   :  { %s1256_s22 = scalar_lea.hbm %s1255_s21, 1  ;;  %p1259_p5 = scmp.lt.s32.totalorder %s1255_s21, %s1630_s4 }
  0xa8   :  { %p1257_p4 = scmp.ne.s32.totalorder %s1255_s21, %s1256_s22  ;;  %p1260_p6 = scmp.lt.s32.totalorder %s1471_s0, %s1256_s22 }
  0xaa   :  { %p1261_p7 = por %p1260_p6, %p1259_p5 }
  0xac   :  { %p1262_p8 = pnand %p1261_p7, %p1257_p4 }
  0xae   :  { %1265 = shalt.err (!%p1262_p8)  }
  0xaf   :  { %280 = dma.hbm_to_vmem [thread:$0]  %s276_s17, 16, %s278_s27, [#allocation4] }
  0xb0   :  { %s290_s24 = sshll.u32 %s281_s7, 4  ;;  %s868_s25 = sld [smem:[#allocation6 + $0x7]]  ;;  %s291_s24 = int_to_ptr.hbm [resolvable:$true] %s290_s24 }
  0xb1   :  { %s1278_s26 = sshra.s32 %s291_s24, 4  ;;  %s1279_s26 = int_to_ptr.hbm [resolvable:$true] %s1278_s26 }
  0xb2   :  { %s1280_s23 = scalar_lea.hbm %s1279_s26, 1  ;;  %p1283_p10 = scmp.lt.s32.totalorder %s1279_s26, %s1630_s4 }
  0xb3   :  { %p1281_p9 = scmp.ne.s32.totalorder %s1279_s26, %s1280_s23  ;;  %p1284_p11 = scmp.lt.s32.totalorder %s1471_s0, %s1280_s23 }
  0xb5   :  { %p1285_p12 = por %p1284_p11, %p1283_p10 }
  0xb7   :  { %p1286_p13 = pnand %p1285_p12, %p1281_p9 }
  0xb9   :  { %1289 = shalt.err (!%p1286_p13)  }
  0xba   :  { %295 = dma.hbm_to_vmem [thread:$0]  %s291_s24, 16, %s293_s12, [#allocation4 + $0x2] }
  0xbb   :  { %s1403_s30 = smov [#allocation2 + $0x7]   ;;  %s869_s27 = sld [smem:[#allocation7 + $0x7]] }
  0xbc   :  { %s310_s6 = sshll.u32 %s1403_s30, 4  ;;  %s299_s28 = scalar_lea.hbm %s1630_s4, %s868_s25  ;;  %s311_s6 = int_to_ptr.vmem [resolvable:$true] %s310_s6 }
  0xbd   :  { %s308_s15 = sshll.u32 %s299_s28, 4  ;;  %s1404_s1 = smov [#allocation3 + $0x7]   ;;  %s309_s15 = int_to_ptr.hbm [resolvable:$true] %s308_s15 }
  0xbe   :  { %s325_s9 = sshll.u32 %s1404_s1, 4  ;;  %s1302_s8 = sshra.s32 %s309_s15, 4  ;;  %s1303_s8 = int_to_ptr.hbm [resolvable:$true] %s1302_s8  ;;  %s326_s9 = int_to_ptr.vmem [resolvable:$true] %s325_s9 }
  0xbf   :  { %s1304_s16 = scalar_lea.hbm %s1303_s8, 1  ;;  %p1307_p1 = scmp.lt.s32.totalorder %s1303_s8, %s1630_s4 }
  0xc0   :  { %p1305_p0 = scmp.ne.s32.totalorder %s1303_s8, %s1304_s16  ;;  %p1308_p2 = scmp.lt.s32.totalorder %s1471_s0, %s1304_s16 }
  0xc2   :  { %p1309_p3 = por %p1308_p2, %p1307_p1 }
  0xc4   :  { %p1310_p4 = pnand %p1309_p3, %p1305_p0 }
  0xc6   :  { %1313 = shalt.err (!%p1310_p4)  }
  0xc7   :  { %313 = dma.hbm_to_vmem [thread:$0]  %s309_s15, 16, %s311_s6, [#allocation4] }
  0xc8   :  { %s314_s20 = scalar_lea.hbm %s1630_s4, %s869_s27 }
  0xc9   :  { %s323_s7 = sshll.u32 %s314_s20, 4  ;;  %s324_s7 = int_to_ptr.hbm [resolvable:$true] %s323_s7 }
  0xca   :  { %s1326_s21 = sshra.s32 %s324_s7, 4  ;;  %s1327_s21 = int_to_ptr.hbm [resolvable:$true] %s1326_s21 }
  0xcb   :  { %s1328_s22 = scalar_lea.hbm %s1327_s21, 1  ;;  %p1331_p6 = scmp.lt.s32.totalorder %s1327_s21, %s1630_s4 }
  0xcc   :  { %p1329_p5 = scmp.ne.s32.totalorder %s1327_s21, %s1328_s22  ;;  %p1332_p7 = scmp.lt.s32.totalorder %s1471_s0, %s1328_s22 }
  0xce   :  { %p1333_p8 = por %p1332_p7, %p1331_p6 }
  0xd0   :  { %p1334_p9 = pnand %p1333_p8, %p1329_p5 }
  0xd2   :  { %1337 = shalt.err (!%p1334_p9)  }
  0xd3   :  { %328 = dma.hbm_to_vmem [thread:$0]  %s324_s7, 16, %s326_s9, [#allocation4 + $0x2] }
  0xd4   :  { %1378 = dma.done.wait [#allocation4], 128 }
  0xd5   :  { %1379 = vsyncadd [#allocation4], 4294967168 }
  0xd6   :  { %1380 = dma.done.wait [#allocation4 + $0x2], 128 }
  0xd7   :  { %1381 = vsyncadd [#allocation4 + $0x2], 4294967168  ;;  %v1405_v0 = vmov 0   ;;  %v644_v1 = vld [vmem:[%s1628_s2] sm:$0xff]  ;;  %v655_v2 = vld [vmem:[#allocation8 + $0x10] sm:$0xff]  ;;  %v645_v6 = vlaneseq  ;;  %vm657_vm0 = vcmask 130048  }
  0xd8   :  { %917 = vset.pattern.permute.xlu0 %v1405_v0  ;;  %v656_v3 = vld [vmem:[#allocation8 + $0x18] sm:$0xff]  ;;  %675 = vmatpush.msra.mxu0 %v655_v2  ;;  %v653_v4 = vld [vmem:[#allocation8] sm:$0xff]  ;;  %v654_v5 = vld [vmem:[#allocation8 + $0x8] sm:$0xff]  ;;  %v1406_v9 = vmov 0.0   ;;  %s1407_s2 = smov [#allocation11]   ;;  %s725_s23 = sshll.u32 %s1631_s5, 4  ;;  %s726_s23 = int_to_ptr.hbm [resolvable:$true] %s725_s23 }
  0xd9   :  { %648 = vperm.xlu0 %917, %v644_v1   ;;  %695 = vmatpush.msra.mxu1 %v656_v3  ;;  %v646_v7 = vand.u32 127, %v645_v6  ;;  %v642_v11 = vld [vmem:[#allocation2] sm:$0xff]  ;;  %v643_v12 = vld [vmem:[#allocation3] sm:$0xff]  ;;  %s723_s4 = sshll.u32 %s1407_s2, 4  ;;  %vm714_vm2 = vcmask 57344   ;;  %s724_s4 = int_to_ptr.vmem [resolvable:$true] %s723_s4 }
  0xda   :  { %676 = vmatpush.msra.mxu0 %v653_v4  ;;  %v701_v13 = vsub.f32 %v642_v11, %v643_v12 }
  0xdb   :  { %696 = vmatpush.msra.mxu1 %v654_v5 }
 0x14b   :  { %v649_v8 = vpop.permute.xlu0 %648 }
 0x14c   :  { %vm650_vm1 = vcmp.eq.s32.totalorder %v649_v8, %v646_v7 }
 0x14d   :  { %v886_v10 = vsel %vm650_vm1, 1.0, %v1406_v9 }
 0x14e   :  { %887 = vmatmul.msk.f32.vlgmr.msra.gmra.mxu0 %vm657_vm0, %v886_v10  ;;  %888 = vmatmul.msk.f32.vlgmr.msra.gmra.mxu1 %vm657_vm0, %v886_v10 }
 0x1cb   :  { %v698_v14 = vpop.f32.mrf.mxu1  ;;  %v678_v16 = vpop.f32.mrf.mxu0 }
 0x1cc   :  { %v703_v15 = vmul.f32 %v701_v13, %v698_v14  ;;  %v702_v18 = vadd.f32 %v701_v13, %v678_v16 }
 0x1ce   :  { %704 = vadd.xlane.f32.xlu0 %v703_v15 }
 0x241   :  { %v705_v17 = vpop.xlane.xlu0 %704 }
 0x242   :  { %v706_v19 = vmul.f32 %v705_v17, %v698_v14 }
 0x244   :  { %v707_v20 = vsub.f32 %v702_v18, %v706_v19 }
 0x246   :  { %v708_v21 = vand.u32 2147483647, %v707_v20 }
 0x248   :  { %709 = vadd.xlane.f32.xlu1 %v708_v21 }
 0x2bb   :  { %v710_v22 = vpop.xlane.xlu1 %709 }
 0x2bc   :  { %v712_v23 = vperm.slane %v710_v22, %v646_v7 }
 0x2be   :  { %715 = vst.msk [vmem:[#allocation11] sm:$0x1] %vm714_vm2, %v712_v23 }
 0x2bf   :  { %728 = dma.vmem_to_hbm [thread:$0]  %s724_s4, 16, %s726_s23, [#allocation10]  }
 0x2c0   :  { %1382 = dma.done.wait [#allocation10], 16  }
 0x2c1   :  { %1383 = vsyncadd [#allocation10], 4294967280 }
 0x2c2   :  { %733 = vsyncpa [#allocation9], 1 }
 0x2c3   :  { %734 = vsyncpa [#allocation10], 1 }
 0x2c4   :  { %735 = vsyncmov [#allocation4] }
 0x2c7   :  { %s736_s29 = vpop.sfrf %735 }
 0x2c8   :  { %p889_p10 = scmp.ne.s32.totalorder %s736_s29, 0 }
 0x2ca   :  { %740 = shalt.err (%p889_p10)  }
 0x2cb   :  { %742 = vsyncmov [#allocation4 + $0x1] }
 0x2ce   :  { %s743_s13 = vpop.sfrf %742 }
 0x2cf   :  { %p890_p11 = scmp.ne.s32.totalorder %s743_s13, 0 }
 0x2d1   :  { %747 = shalt.err (%p890_p11)  }
 0x2d2   :  { %749 = vsyncmov [#allocation4 + $0x2] }
 0x2d5   :  { %s750_s5 = vpop.sfrf %749 }
 0x2d6   :  { %p891_p12 = scmp.ne.s32.totalorder %s750_s5, 0 }
 0x2d8   :  { %754 = shalt.err (%p891_p12)  }
 0x2d9   :  { %756 = vsyncmov [#allocation4 + $0x3] }
 0x2dc   :  { %s757_s30 = vpop.sfrf %756 }
 0x2dd   :  { %p892_p13 = scmp.ne.s32.totalorder %s757_s30, 0 }
 0x2df   :  { %761 = shalt.err (%p892_p13)  }

</bundles_post_ra>
